<compile_context>
chip_gen: v5e
topology: v5e:2x2
jax: 0.10.0
libtpu: 0.0.40
codegen_flags: <defaults>
</compile_context>

<pallas_src>
import functools

import jax
import jax.numpy as jnp
from jax.experimental import pallas as pl
from jax.experimental.pallas import tpu as pltpu

EPS = 1e-5
LANE = 128


def _round_up(x, m):
    return ((x + m - 1) // m) * m


def _device_kind():
    try:
        return jax.devices()[0].device_kind.lower()
    except Exception:
        return ""


def _vmem_capacity_bytes():
    try:
        return int(pltpu.get_tpu_info().vmem_capacity_bytes)
    except Exception:
        return 64 << 20  # conservative (v7x-sized) fallback


def _pick_tm(n_pad, kind):
    # v5e/v5p/v4/v3: 128-row MXU -> 128 tiles saturate it; v6e/v7x: 256-wide MXU.
    want = 128 if ("v5" in kind or "v4" in kind or "v3" in kind) else 256
    if n_pad >= want and n_pad % want == 0:
        return want
    return 128


def _pick_tk(n_pad, cap=2048):
    cap = min(cap, n_pad)
    for t in range(cap, 0, -LANE):
        if n_pad % t == 0:
            return t
    return LANE


def _fused_gcn2_kernel(a_ref, x_ref, w1_ref, w2_ref, p_ref, o_ref,
                       xw_s, h_s, st_s,
                       *, tm, tk, n_real, d1p, d2p, eps):
    p = pl.program_id(0)          # phase
    i = pl.program_id(1)          # row tile
    k = pl.program_id(2)          # K tile (A columns) -- only used in phases 1/3
    nk = pl.num_programs(2)

    row0 = pl.multiple_of(i * tm, tm)
    rows = pl.ds(row0, tm)
    col0 = pl.multiple_of(k * tk, tk)
    kcols = pl.ds(col0, tk)
    inv_n = 1.0 / float(n_real)

    # valid-row mask (exclude zero-padded node rows from BN statistics)
    gid = jax.lax.broadcasted_iota(jnp.int32, (tm, 1), 0) + i * tm
    vmask = (gid < n_real).astype(jnp.float32)               # (tm, 1)

    # ---------------- phase 0: XW1 slab (and zero the stats scratch) --------
    @pl.when((p == 0) & (k == 0))
    def _():
        @pl.when(i == 0)
        def _():
            st_s[...] = jnp.zeros_like(st_s)
        xw1 = jnp.dot(x_ref[...], w1_ref[...],
                      preferred_element_type=jnp.float32)
        xw_s[rows, :d1p] = xw1.astype(xw_s.dtype)

    # ---------------- phase 1: H1 = A @ XW1 + b1 ; accumulate BN1 stats -----
    @pl.when(p == 1)
    def _():
        part = jnp.dot(a_ref[...], xw_s[kcols, :d1p],
                       preferred_element_type=jnp.float32)

        @pl.when(k == 0)
        def _():
            h_s[rows, :d1p] = part

        @pl.when(k > 0)
        def _():
            h_s[rows, :d1p] = h_s[rows, :d1p] + part

        @pl.when(k == nk - 1)
        def _():
            h = h_s[rows, :d1p] + p_ref[0:1, :d1p]            # + b1
            h_s[rows, :d1p] = h
            hm = h * vmask
            stats = jnp.concatenate(
                [jnp.sum(hm, axis=0, keepdims=True),
                 jnp.sum(hm * h, axis=0, keepdims=True)], axis=0)
            st_s[0:2, :d1p] = st_s[0:2, :d1p] + stats         # coalesced RMW

    # ---------------- phase 2: BN1 + PReLU1, then XW2 slab ------------------
    @pl.when((p == 2) & (k == 0))
    def _():
        @pl.when(i == 0)
        def _():
            mean = st_s[0:1, :d1p] * inv_n
            # TODO(synk): E[x^2]-E[x]^2 variance is one-pass; fine at 5e-2 tol.
            var = jnp.maximum(st_s[1:2, :d1p] * inv_n - mean * mean, 0.0)
            scale = p_ref[1:2, :d1p] * jax.lax.rsqrt(var + eps)   # gamma1*rsqrt
            st_s[4:5, :d1p] = scale
            st_s[5:6, :d1p] = p_ref[2:3, :d1p] - mean * scale     # beta1-mean*s
        y = h_s[rows, :d1p] * st_s[4:5, :d1p] + st_s[5:6, :d1p]
        z = jnp.where(y > 0, y, p_ref[6:7, :d1p] * y)             # PReLU(alpha1)
        xw2 = jnp.dot(z.astype(w2_ref.dtype), w2_ref[...],
                      preferred_element_type=jnp.float32)
        xw_s[rows, :d2p] = xw2.astype(xw_s.dtype)                 # reuse slab

    # ---------------- phase 3: H2 = A @ XW2 + b2 ; accumulate BN2 stats -----
    @pl.when(p == 3)
    def _():
        part = jnp.dot(a_ref[...], xw_s[kcols, :d2p],
                       preferred_element_type=jnp.float32)

        @pl.when(k == 0)
        def _():
            h_s[rows, :d2p] = part

        @pl.when(k > 0)
        def _():
            h_s[rows, :d2p] = h_s[rows, :d2p] + part

        @pl.when(k == nk - 1)
        def _():
            h = h_s[rows, :d2p] + p_ref[3:4, :d2p]            # + b2
            h_s[rows, :d2p] = h
            hm = h * vmask
            stats = jnp.concatenate(
                [jnp.sum(hm, axis=0, keepdims=True),
                 jnp.sum(hm * h, axis=0, keepdims=True)], axis=0)
            st_s[2:4, :d2p] = st_s[2:4, :d2p] + stats

    # ---------------- phase 4: BN2 + PReLU2 -> output -----------------------
    @pl.when((p == 4) & (k == 0))
    def _():
        @pl.when(i == 0)
        def _():
            mean = st_s[2:3, :d2p] * inv_n
            var = jnp.maximum(st_s[3:4, :d2p] * inv_n - mean * mean, 0.0)
            scale = p_ref[4:5, :d2p] * jax.lax.rsqrt(var + eps)
            st_s[6:7, :d2p] = scale
            st_s[7:8, :d2p] = p_ref[5:6, :d2p] - mean * scale
        y = h_s[rows, :d2p] * st_s[6:7, :d2p] + st_s[7:8, :d2p]
        o_ref[...] = jnp.where(y > 0, y, p_ref[7:8, :d2p] * y)


def _pad2(x, rows, cols, dtype):
    out = jnp.zeros((rows, cols), dtype)
    return out.at[: x.shape[0], : x.shape[1]].set(x.astype(dtype))


def gcn2_forward(a_hat, feats, layer_params, *, tm=None, tk_cap=2048):
    """Fused forward of (GraphConv -> BatchNorm1d -> PReLU) x 2 in one pallas_call."""
    (w1, b1, g1, be1, al1), (w2, b2, g2, be2, al2) = layer_params
    n_real, din = feats.shape
    d1 = w1.shape[1]
    d2 = w2.shape[1]

    n_pad = _round_up(n_real, LANE)                 # lane-dense adjacency columns
    dinp = _round_up(din, LANE)
    d1p = _round_up(d1, LANE)
    d2p = _round_up(d2, LANE)
    pmax = max(d1p, d2p)

    kind = _device_kind()
    if tm is None:
        tm = _pick_tm(n_pad, kind)
    tm = min(tm, n_pad)
    assert tm % 16 == 0 and n_pad % tm == 0, "row tile must divide n_pad"
    tk = _pick_tk(n_pad, tk_cap)
    n_tiles = n_pad // tm
    k_tiles = n_pad // tk

    # ---- host-side padding / bf16 casts (matmuls run bf16, accumulate f32) ----
    a_p = _pad2(a_hat, n_pad, n_pad, jnp.bfloat16)
    x_p = _pad2(feats, n_pad, dinp, jnp.bfloat16)
    w1_p = _pad2(w1, dinp, d1p, jnp.bfloat16)
    w2_p = _pad2(w2, d1p, d2p, jnp.bfloat16)

    # pack all small per-feature params into ONE aligned (8, pmax) f32 tile
    pk = jnp.zeros((8, pmax), jnp.float32)
    pk = pk.at[0, :d1].set(jnp.asarray(b1, jnp.float32).reshape(-1))
    pk = pk.at[1, :d1].set(jnp.asarray(g1, jnp.float32).reshape(-1))
    pk = pk.at[2, :d1].set(jnp.asarray(be1, jnp.float32).reshape(-1))
    pk = pk.at[3, :d2].set(jnp.asarray(b2, jnp.float32).reshape(-1))
    pk = pk.at[4, :d2].set(jnp.asarray(g2, jnp.float32).reshape(-1))
    pk = pk.at[5, :d2].set(jnp.asarray(be2, jnp.float32).reshape(-1))
    pk = pk.at[6, :].set(jnp.asarray(al1, jnp.float32).reshape(-1)[0])
    pk = pk.at[7, :].set(jnp.asarray(al2, jnp.float32).reshape(-1)[0])

    # ---- phase-conditional, pin-on-unused index maps (no redundant refetch) ---
    def a_map(p, i, k):
        use = jnp.logical_or(p == 1, p == 3)
        row = jnp.where(use, i, jnp.where(p == 0, 0, n_tiles - 1))
        col = jnp.where(use, k, jnp.where(p == 0, 0, k_tiles - 1))
        return (row, col)

    def x_map(p, i, k):
        return (jnp.where(p == 0, i, n_tiles - 1), 0)

    def o_map(p, i, k):
        return (jnp.where(p == 4, i, 0), 0)

    const = lambda p, i, k: (0, 0)

    kernel = functools.partial(_fused_gcn2_kernel, tm=tm, tk=tk, n_real=n_real,
                               d1p=d1p, d2p=d2p, eps=EPS)

    # ---- cost / VMEM hints (generation-aware) ----
    flops = (2 * n_pad * dinp * d1p + 2 * n_pad * n_pad * d1p
             + 2 * n_pad * d1p * d2p + 2 * n_pad * n_pad * d2p)
    bytes_accessed = (2 * n_pad * n_pad * 2 + n_pad * dinp * 2
                      + dinp * d1p * 2 + d1p * d2p * 2
                      + 8 * pmax * 4 + n_pad * d2p * 4)
    scratch_bytes = n_pad * pmax * 2 + n_pad * pmax * 4 + 8 * pmax * 4
    blocks_bytes = 2 * (tm * tk * 2 + tm * dinp * 2 + dinp * d1p * 2
                        + d1p * d2p * 2 + 8 * pmax * 4 + tm * d2p * 4)
    needed = scratch_bytes + blocks_bytes + (2 << 20)
    cap = max((_vmem_capacity_bytes() * 3) // 4, 32 << 20)
    vmem_limit = int(min(max(needed, 8 << 20), cap))

    out_padded = pl.pallas_call(
        kernel,
        # output kept f32 to match the PyTorch module dtype (bf16 would halve writeback)
        out_shape=jax.ShapeDtypeStruct((n_pad, d2p), jnp.float32),
        grid_spec=pltpu.PrefetchScalarGridSpec(
            num_scalar_prefetch=0,
            grid=(5, n_tiles, k_tiles),
            in_specs=[
                pl.BlockSpec((tm, tk), a_map),         # A_hat (bf16), K-tiled stream
                pl.BlockSpec((tm, dinp), x_map),       # X row tiles (bf16)
                pl.BlockSpec((dinp, d1p), const),      # W1 (bf16, resident)
                pl.BlockSpec((d1p, d2p), const),       # W2 (bf16, resident)
                pl.BlockSpec((8, pmax), const),        # packed b/gamma/beta/alpha
            ],
            out_specs=pl.BlockSpec((tm, d2p), o_map),
            scratch_shapes=[
                pltpu.VMEM((n_pad, pmax), jnp.bfloat16),  # XW slab (XW1 then XW2)
                pltpu.VMEM((n_pad, pmax), jnp.float32),   # H slab  (H1  then H2)
                pltpu.VMEM((8, pmax), jnp.float32),       # BN stats / scale / shift
            ],
        ),
        compiler_params=pltpu.CompilerParams(
            dimension_semantics=("arbitrary", "arbitrary", "arbitrary"),
            vmem_limit_bytes=vmem_limit),
        cost_estimate=pl.CostEstimate(flops=flops, transcendentals=2 * (d1p + d2p),
                                      bytes_accessed=bytes_accessed),
    )(a_p, x_p, w1_p, w2_p, pk)

    return out_padded[:n_real, :d2]


def gcn_forward(a_hat, feats, params, *, tm=None):
    # TODO(synk): generalize the fused phase schedule to >2 layers (BGRL uses a 2-layer GCN).
    assert len(params) == 2, "fused kernel implements the standard 2-layer BGRL GCN"
    return gcn2_forward(a_hat, feats, params, tm=tm)


# ----------------------------- reference & setup -----------------------------

def gcn_reference(a_hat, feats, layer_params, eps=EPS):
    """Pure-JAX reference with the same precision policy (bf16 matmuls, f32 acc)."""
    a_bf = a_hat.astype(jnp.bfloat16)
    x = feats
    for (w, b, gamma, beta, alpha) in layer_params:
        xw = jnp.dot(x.astype(jnp.bfloat16), w.astype(jnp.bfloat16),
                     preferred_element_type=jnp.float32)
        h = jnp.dot(a_bf, xw.astype(jnp.bfloat16),
                    preferred_element_type=jnp.float32) + b
        mean = jnp.mean(h, axis=0, keepdims=True)
        var = jnp.mean(jnp.square(h - mean), axis=0, keepdims=True)
        y = gamma * (h - mean) * jax.lax.rsqrt(var + eps) + beta
        x = jnp.where(y > 0, y, alpha * y)
    return x


def make_params(key, layer_sizes):
    """GraphConv: xavier_uniform W, zero bias. BN: gamma=1, beta=0. PReLU: alpha=0.25."""
    params = []
    for in_dim, out_dim in zip(layer_sizes[:-1], layer_sizes[1:]):
        key, wk = jax.random.split(key)
        limit = (6.0 / (in_dim + out_dim)) ** 0.5
        w = jax.random.uniform(wk, (in_dim, out_dim), jnp.float32, -limit, limit)
        b = jnp.zeros((1, out_dim), jnp.float32)
        gamma = jnp.ones((1, out_dim), jnp.float32)
        beta = jnp.zeros((1, out_dim), jnp.float32)
        alpha = jnp.full((1, 1), 0.25, jnp.float32)
        params.append((w, b, gamma, beta, alpha))
    return params


def make_normalized_adj(key, n):
    """Random undirected graph with self-loops, D^{-1/2} A D^{-1/2}."""
    raw = jax.random.bernoulli(key, p=0.3, shape=(n, n)).astype(jnp.float32)
    adj = jnp.maximum(raw, raw.T)
    adj = jnp.maximum(adj, jnp.eye(n, dtype=jnp.float32))
    deg = jnp.sum(adj, axis=1)
    d_inv_sqrt = 1.0 / jnp.sqrt(deg)
    return adj * d_inv_sqrt[:, None] * d_inv_sqrt[None, :]


if __name__ == "__main__":
    key = jax.random.PRNGKey(0)
    k_adj, k_feat, k_param = jax.random.split(key, 3)

    num_nodes = 40                       # padded to 128 rows -> 1 row tile
    layer_sizes = [8, 32, 16]            # feats=8 -> hidden=32 -> out=16

    a_hat = make_normalized_adj(k_adj, num_nodes)
    feats = jax.random.normal(k_feat, (num_nodes, layer_sizes[0]), jnp.float32)
    params = make_params(k_param, layer_sizes)

    out = gcn_forward(a_hat, feats, params)      # tm/tk chosen automatically
    out = jax.block_until_ready(out)

    assert out.shape == (num_nodes, layer_sizes[-1])
    assert bool(jnp.all(jnp.isfinite(out)))

    ref = gcn_reference(a_hat, feats, params)
    max_err = float(jnp.max(jnp.abs(out - ref)))
    assert max_err < 5e-2, f"kernel deviates from reference: {max_err}"

    print("KERNEL_OK")
</pallas_src>

<mosaic_0001>
module attributes {stable_mosaic.version = 11 : i64} {
  func.func @_fused_gcn2_kernel(%arg0: i32, %arg1: i32, %arg2: i32, %arg3: memref<128x128xbf16, #tpu.memory_space<vmem>>, %arg4: memref<128x128xbf16, #tpu.memory_space<vmem>>, %arg5: memref<128x128xbf16, #tpu.memory_space<vmem>>, %arg6: memref<128x128xbf16, #tpu.memory_space<vmem>>, %arg7: memref<8x128xf32, #tpu.memory_space<vmem>>, %arg8: memref<128x128xf32, #tpu.memory_space<vmem>>, %arg9: memref<128x128xbf16, #tpu.memory_space<vmem>>, %arg10: memref<128x128xf32, #tpu.memory_space<vmem>>, %arg11: memref<8x128xf32, #tpu.memory_space<vmem>>) attributes {dimension_semantics = [#tpu.dimension_semantics<arbitrary>, #tpu.dimension_semantics<arbitrary>, #tpu.dimension_semantics<arbitrary>], iteration_bounds = array<i64: 5, 1, 1>, scalar_prefetch = 0 : i64, scratch_operands = 3 : i64, tpu.core_type = #tpu.core_type<tc>, window_params = [{transform_indices = @transform_0, window_bounds = array<i64: 128, 128>}, {transform_indices = @transform_1, window_bounds = array<i64: 128, 128>}, {pipeline_mode = #tpu.pipeline_mode<synchronous>, transform_indices = @transform_2, window_bounds = array<i64: 128, 128>}, {pipeline_mode = #tpu.pipeline_mode<synchronous>, transform_indices = @transform_3, window_bounds = array<i64: 128, 128>}, {pipeline_mode = #tpu.pipeline_mode<synchronous>, transform_indices = @transform_4, window_bounds = array<i64: 8, 128>}, {transform_indices = @transform_5, window_bounds = array<i64: 128, 128>}]} {
    %c128_i32 = arith.constant 128 : i32
    %0 = arith.muli %arg1, %c128_i32 : i32
    %1 = tpu.assume_multiple %0, 128 : i32
    %c128_i32_0 = arith.constant 128 : i32
    %2 = arith.muli %arg2, %c128_i32_0 : i32
    %3 = tpu.assume_multiple %2, 128 : i32
    %4 = tpu.iota {dimensions = array<i32: 0>} : vector<128x1xi32>
    %c128_i32_1 = arith.constant 128 : i32
    %5 = arith.muli %arg1, %c128_i32_1 : i32
    %6 = vector.broadcast %5 : i32 to vector<128x1xi32>
    %7 = arith.addi %4, %6 : vector<128x1xi32>
    %c40_i32 = arith.constant 40 : i32
    %8 = vector.broadcast %c40_i32 : i32 to vector<128x1xi32>
    %9 = arith.cmpi slt, %7, %8 : vector<128x1xi32>
    %10 = arith.extui %9 : vector<128x1xi1> to vector<128x1xi32>
    %11 = arith.sitofp %10 : vector<128x1xi32> to vector<128x1xf32>
    %c0_i32 = arith.constant 0 : i32
    %12 = arith.cmpi eq, %arg0, %c0_i32 : i32
    %c0_i32_2 = arith.constant 0 : i32
    %13 = arith.cmpi eq, %arg2, %c0_i32_2 : i32
    %14 = arith.andi %12, %13 : i1
    %15 = arith.extui %14 : i1 to i32
    %c0_i32_3 = arith.constant 0 : i32
    %16 = arith.cmpi ne, %15, %c0_i32_3 : i32
    scf.if %16 {
      %c0_i32_10 = arith.constant 0 : i32
      %33 = arith.cmpi eq, %arg1, %c0_i32_10 : i32
      %34 = arith.extui %33 : i1 to i32
      %c0_i32_11 = arith.constant 0 : i32
      %35 = arith.cmpi ne, %34, %c0_i32_11 : i32
      scf.if %35 {
        %cst_16 = arith.constant 0.000000e+00 : f32
        %42 = vector.broadcast %cst_16 : f32 to vector<8x128xf32>
        %c0_17 = arith.constant 0 : index
        %c0_18 = arith.constant 0 : index
        %43 = vector.load %arg11[%c0_17, %c0_18] : memref<8x128xf32, #tpu.memory_space<vmem>>, vector<8x128xf32>
        tpu.vector_store %arg11[%c0_17, %c0_18], %42 {strides = array<i32>} : memref<8x128xf32, #tpu.memory_space<vmem>>, vector<8x128xf32>,
      } else {
      }
      %c0 = arith.constant 0 : index
      %c0_12 = arith.constant 0 : index
      %36 = vector.load %arg4[%c0, %c0_12] : memref<128x128xbf16, #tpu.memory_space<vmem>>, vector<128x128xbf16>
      %c0_13 = arith.constant 0 : index
      %c0_14 = arith.constant 0 : index
      %37 = vector.load %arg5[%c0_13, %c0_14] : memref<128x128xbf16, #tpu.memory_space<vmem>>, vector<128x128xbf16>
      %cst = arith.constant dense<0.000000e+00> : vector<128x128xf32>
      %38 = tpu.matmul %36, %37, %cst {dimension_numbers = #tpu.dot_dimension_numbers<[1], [0], [0], [1], [0, 0, 1, 1], [], []>} : vector<128x128xbf16>, vector<128x128xbf16>, vector<128x128xf32> -> vector<128x128xf32>
      %39 = arith.truncf %38 : vector<128x128xf32> to vector<128x128xbf16>
      %40 = arith.index_cast %1 : i32 to index
      %c0_15 = arith.constant 0 : index
      %41 = vector.load %arg9[%40, %c0_15] : memref<128x128xbf16, #tpu.memory_space<vmem>>, vector<128x128xbf16>
      tpu.vector_store %arg9[%40, %c0_15], %39 {strides = array<i32>} : memref<128x128xbf16, #tpu.memory_space<vmem>>, vector<128x128xbf16>,
    } else {
    }
    %c1_i32 = arith.constant 1 : i32
    %17 = arith.cmpi eq, %arg0, %c1_i32 : i32
    %18 = arith.extui %17 : i1 to i32
    %c0_i32_4 = arith.constant 0 : i32
    %19 = arith.cmpi ne, %18, %c0_i32_4 : i32
    scf.if %19 {
      %c0 = arith.constant 0 : index
      %c0_10 = arith.constant 0 : index
      %33 = vector.load %arg3[%c0, %c0_10] : memref<128x128xbf16, #tpu.memory_space<vmem>>, vector<128x128xbf16>
      %34 = arith.index_cast %3 : i32 to index
      %c0_11 = arith.constant 0 : index
      %35 = vector.load %arg9[%34, %c0_11] : memref<128x128xbf16, #tpu.memory_space<vmem>>, vector<128x128xbf16>
      %cst = arith.constant dense<0.000000e+00> : vector<128x128xf32>
      %36 = tpu.matmul %33, %35, %cst {dimension_numbers = #tpu.dot_dimension_numbers<[1], [0], [0], [1], [0, 0, 1, 1], [], []>} : vector<128x128xbf16>, vector<128x128xbf16>, vector<128x128xf32> -> vector<128x128xf32>
      %c0_i32_12 = arith.constant 0 : i32
      %37 = arith.cmpi eq, %arg2, %c0_i32_12 : i32
      %38 = arith.extui %37 : i1 to i32
      %c0_i32_13 = arith.constant 0 : i32
      %39 = arith.cmpi ne, %38, %c0_i32_13 : i32
      scf.if %39 {
        %46 = arith.index_cast %1 : i32 to index
        %c0_18 = arith.constant 0 : index
        %47 = vector.load %arg10[%46, %c0_18] : memref<128x128xf32, #tpu.memory_space<vmem>>, vector<128x128xf32>
        tpu.vector_store %arg10[%46, %c0_18], %36 {strides = array<i32>} : memref<128x128xf32, #tpu.memory_space<vmem>>, vector<128x128xf32>,
      } else {
      }
      %c0_i32_14 = arith.constant 0 : i32
      %40 = arith.cmpi sgt, %arg2, %c0_i32_14 : i32
      %41 = arith.extui %40 : i1 to i32
      %c0_i32_15 = arith.constant 0 : i32
      %42 = arith.cmpi ne, %41, %c0_i32_15 : i32
      scf.if %42 {
        %46 = arith.index_cast %1 : i32 to index
        %c0_18 = arith.constant 0 : index
        %47 = vector.load %arg10[%46, %c0_18] : memref<128x128xf32, #tpu.memory_space<vmem>>, vector<128x128xf32>
        %48 = arith.addf %47, %36 : vector<128x128xf32>
        %49 = arith.index_cast %1 : i32 to index
        %c0_19 = arith.constant 0 : index
        %50 = vector.load %arg10[%49, %c0_19] : memref<128x128xf32, #tpu.memory_space<vmem>>, vector<128x128xf32>
        tpu.vector_store %arg10[%49, %c0_19], %48 {strides = array<i32>} : memref<128x128xf32, #tpu.memory_space<vmem>>, vector<128x128xf32>,
      } else {
      }
      %c0_i32_16 = arith.constant 0 : i32
      %43 = arith.cmpi eq, %arg2, %c0_i32_16 : i32
      %44 = arith.extui %43 : i1 to i32
      %c0_i32_17 = arith.constant 0 : i32
      %45 = arith.cmpi ne, %44, %c0_i32_17 : i32
      scf.if %45 {
        %46 = arith.index_cast %1 : i32 to index
        %c0_18 = arith.constant 0 : index
        %47 = vector.load %arg10[%46, %c0_18] : memref<128x128xf32, #tpu.memory_space<vmem>>, vector<128x128xf32>
        %c0_19 = arith.constant 0 : index
        %c0_20 = arith.constant 0 : index
        %48 = vector.load %arg7[%c0_19, %c0_20] : memref<8x128xf32, #tpu.memory_space<vmem>>, vector<1x128xf32>
        %49 = vector.broadcast %48 : vector<1x128xf32> to vector<128x128xf32>
        %50 = arith.addf %47, %49 : vector<128x128xf32>
        %51 = arith.index_cast %1 : i32 to index
        %c0_21 = arith.constant 0 : index
        %52 = vector.load %arg10[%51, %c0_21] : memref<128x128xf32, #tpu.memory_space<vmem>>, vector<128x128xf32>
        tpu.vector_store %arg10[%51, %c0_21], %50 {strides = array<i32>} : memref<128x128xf32, #tpu.memory_space<vmem>>, vector<128x128xf32>,
        %53 = vector.broadcast %11 : vector<128x1xf32> to vector<128x128xf32>
        %54 = arith.mulf %50, %53 : vector<128x128xf32>
        %cst_22 = arith.constant dense<0.000000e+00> : vector<128xf32>
        %55 = vector.multi_reduction <add>, %54, %cst_22 [0] : vector<128x128xf32> to vector<128xf32>
        %56 = vector.shape_cast %55 : vector<128xf32> to vector<1x128xf32>
        %57 = arith.mulf %54, %50 : vector<128x128xf32>
        %cst_23 = arith.constant dense<0.000000e+00> : vector<128xf32>
        %58 = vector.multi_reduction <add>, %57, %cst_23 [0] : vector<128x128xf32> to vector<128xf32>
        %59 = vector.shape_cast %58 : vector<128xf32> to vector<1x128xf32>
        %60 = tpu.concatenate %56, %59 in 0 : vector<1x128xf32>, vector<1x128xf32> -> vector<2x128xf32>
        %c0_24 = arith.constant 0 : index
        %c0_25 = arith.constant 0 : index
        %61 = vector.load %arg11[%c0_24, %c0_25] : memref<8x128xf32, #tpu.memory_space<vmem>>, vector<2x128xf32>
        %62 = arith.addf %61, %60 : vector<2x128xf32>
        %c0_26 = arith.constant 0 : index
        %c0_27 = arith.constant 0 : index
        %63 = vector.load %arg11[%c0_26, %c0_27] : memref<8x128xf32, #tpu.memory_space<vmem>>, vector<2x128xf32>
        tpu.vector_store %arg11[%c0_26, %c0_27], %62 {strides = array<i32>} : memref<8x128xf32, #tpu.memory_space<vmem>>, vector<2x128xf32>,
      } else {
      }
    } else {
    }
    %c2_i32 = arith.constant 2 : i32
    %20 = arith.cmpi eq, %arg0, %c2_i32 : i32
    %c0_i32_5 = arith.constant 0 : i32
    %21 = arith.cmpi eq, %arg2, %c0_i32_5 : i32
    %22 = arith.andi %20, %21 : i1
    %23 = arith.extui %22 : i1 to i32
    %c0_i32_6 = arith.constant 0 : i32
    %24 = arith.cmpi ne, %23, %c0_i32_6 : i32
    scf.if %24 {
      %c0_i32_10 = arith.constant 0 : i32
      %33 = arith.cmpi eq, %arg1, %c0_i32_10 : i32
      %34 = arith.extui %33 : i1 to i32
      %c0_i32_11 = arith.constant 0 : i32
      %35 = arith.cmpi ne, %34, %c0_i32_11 : i32
      scf.if %35 {
        %c0_19 = arith.constant 0 : index
        %c0_20 = arith.constant 0 : index
        %56 = vector.load %arg11[%c0_19, %c0_20] : memref<8x128xf32, #tpu.memory_space<vmem>>, vector<1x128xf32>
        %cst_21 = arith.constant 2.500000e-02 : f32
        %57 = vector.broadcast %cst_21 : f32 to vector<1x128xf32>
        %58 = arith.mulf %56, %57 : vector<1x128xf32>
        %c1 = arith.constant 1 : index
        %c0_22 = arith.constant 0 : index
        %59 = vector.load %arg11[%c1, %c0_22] : memref<8x128xf32, #tpu.memory_space<vmem>>, vector<1x128xf32>
        %cst_23 = arith.constant 2.500000e-02 : f32
        %60 = vector.broadcast %cst_23 : f32 to vector<1x128xf32>
        %61 = arith.mulf %59, %60 : vector<1x128xf32>
        %62 = arith.mulf %58, %58 : vector<1x128xf32>
        %63 = arith.subf %61, %62 : vector<1x128xf32>
        %cst_24 = arith.constant 0.000000e+00 : f32
        %64 = vector.broadcast %cst_24 : f32 to vector<1x128xf32>
        %65 = arith.maximumf %63, %64 : vector<1x128xf32>
        %c1_25 = arith.constant 1 : index
        %c0_26 = arith.constant 0 : index
        %66 = vector.load %arg7[%c1_25, %c0_26] : memref<8x128xf32, #tpu.memory_space<vmem>>, vector<1x128xf32>
        %cst_27 = arith.constant 9.99999974E-6 : f32
        %67 = vector.broadcast %cst_27 : f32 to vector<1x128xf32>
        %68 = arith.addf %65, %67 : vector<1x128xf32>
        %69 = math.rsqrt %68 : vector<1x128xf32>
        %70 = arith.mulf %66, %69 : vector<1x128xf32>
        %c4_28 = arith.constant 4 : index
        %c0_29 = arith.constant 0 : index
        %71 = vector.load %arg11[%c4_28, %c0_29] : memref<8x128xf32, #tpu.memory_space<vmem>>, vector<1x128xf32>
        tpu.vector_store %arg11[%c4_28, %c0_29], %70 {strides = array<i32>} : memref<8x128xf32, #tpu.memory_space<vmem>>, vector<1x128xf32>,
        %c2 = arith.constant 2 : index
        %c0_30 = arith.constant 0 : index
        %72 = vector.load %arg7[%c2, %c0_30] : memref<8x128xf32, #tpu.memory_space<vmem>>, vector<1x128xf32>
        %73 = arith.mulf %58, %70 : vector<1x128xf32>
        %74 = arith.subf %72, %73 : vector<1x128xf32>
        %c5_31 = arith.constant 5 : index
        %c0_32 = arith.constant 0 : index
        %75 = vector.load %arg11[%c5_31, %c0_32] : memref<8x128xf32, #tpu.memory_space<vmem>>, vector<1x128xf32>
        tpu.vector_store %arg11[%c5_31, %c0_32], %74 {strides = array<i32>} : memref<8x128xf32, #tpu.memory_space<vmem>>, vector<1x128xf32>,
      } else {
      }
      %36 = arith.index_cast %1 : i32 to index
      %c0 = arith.constant 0 : index
      %37 = vector.load %arg10[%36, %c0] : memref<128x128xf32, #tpu.memory_space<vmem>>, vector<128x128xf32>
      %c4 = arith.constant 4 : index
      %c0_12 = arith.constant 0 : index
      %38 = vector.load %arg11[%c4, %c0_12] : memref<8x128xf32, #tpu.memory_space<vmem>>, vector<1x128xf32>
      %39 = vector.broadcast %38 : vector<1x128xf32> to vector<128x128xf32>
      %40 = arith.mulf %37, %39 : vector<128x128xf32>
      %c5 = arith.constant 5 : index
      %c0_13 = arith.constant 0 : index
      %41 = vector.load %arg11[%c5, %c0_13] : memref<8x128xf32, #tpu.memory_space<vmem>>, vector<1x128xf32>
      %42 = vector.broadcast %41 : vector<1x128xf32> to vector<128x128xf32>
      %43 = arith.addf %40, %42 : vector<128x128xf32>
      %cst = arith.constant 0.000000e+00 : f32
      %44 = vector.broadcast %cst : f32 to vector<128x128xf32>
      %45 = arith.cmpf ogt, %43, %44 : vector<128x128xf32>
      %c6 = arith.constant 6 : index
      %c0_14 = arith.constant 0 : index
      %46 = vector.load %arg7[%c6, %c0_14] : memref<8x128xf32, #tpu.memory_space<vmem>>, vector<1x128xf32>
      %47 = vector.broadcast %46 : vector<1x128xf32> to vector<128x128xf32>
      %48 = arith.mulf %47, %43 : vector<128x128xf32>
      %49 = arith.select %45, %43, %48 : vector<128x128xi1>, vector<128x128xf32>
      %50 = arith.truncf %49 : vector<128x128xf32> to vector<128x128xbf16>
      %c0_15 = arith.constant 0 : index
      %c0_16 = arith.constant 0 : index
      %51 = vector.load %arg6[%c0_15, %c0_16] : memref<128x128xbf16, #tpu.memory_space<vmem>>, vector<128x128xbf16>
      %cst_17 = arith.constant dense<0.000000e+00> : vector<128x128xf32>
      %52 = tpu.matmul %50, %51, %cst_17 {dimension_numbers = #tpu.dot_dimension_numbers<[1], [0], [0], [1], [0, 0, 1, 1], [], []>} : vector<128x128xbf16>, vector<128x128xbf16>, vector<128x128xf32> -> vector<128x128xf32>
      %53 = arith.truncf %52 : vector<128x128xf32> to vector<128x128xbf16>
      %54 = arith.index_cast %1 : i32 to index
      %c0_18 = arith.constant 0 : index
      %55 = vector.load %arg9[%54, %c0_18] : memref<128x128xbf16, #tpu.memory_space<vmem>>, vector<128x128xbf16>
      tpu.vector_store %arg9[%54, %c0_18], %53 {strides = array<i32>} : memref<128x128xbf16, #tpu.memory_space<vmem>>, vector<128x128xbf16>,
    } else {
    }
    %c3_i32 = arith.constant 3 : i32
    %25 = arith.cmpi eq, %arg0, %c3_i32 : i32
    %26 = arith.extui %25 : i1 to i32
    %c0_i32_7 = arith.constant 0 : i32
    %27 = arith.cmpi ne, %26, %c0_i32_7 : i32
    scf.if %27 {
      %c0 = arith.constant 0 : index
      %c0_10 = arith.constant 0 : index
      %33 = vector.load %arg3[%c0, %c0_10] : memref<128x128xbf16, #tpu.memory_space<vmem>>, vector<128x128xbf16>
      %34 = arith.index_cast %3 : i32 to index
      %c0_11 = arith.constant 0 : index
      %35 = vector.load %arg9[%34, %c0_11] : memref<128x128xbf16, #tpu.memory_space<vmem>>, vector<128x128xbf16>
      %cst = arith.constant dense<0.000000e+00> : vector<128x128xf32>
      %36 = tpu.matmul %33, %35, %cst {dimension_numbers = #tpu.dot_dimension_numbers<[1], [0], [0], [1], [0, 0, 1, 1], [], []>} : vector<128x128xbf16>, vector<128x128xbf16>, vector<128x128xf32> -> vector<128x128xf32>
      %c0_i32_12 = arith.constant 0 : i32
      %37 = arith.cmpi eq, %arg2, %c0_i32_12 : i32
      %38 = arith.extui %37 : i1 to i32
      %c0_i32_13 = arith.constant 0 : i32
      %39 = arith.cmpi ne, %38, %c0_i32_13 : i32
      scf.if %39 {
        %46 = arith.index_cast %1 : i32 to index
        %c0_18 = arith.constant 0 : index
        %47 = vector.load %arg10[%46, %c0_18] : memref<128x128xf32, #tpu.memory_space<vmem>>, vector<128x128xf32>
        tpu.vector_store %arg10[%46, %c0_18], %36 {strides = array<i32>} : memref<128x128xf32, #tpu.memory_space<vmem>>, vector<128x128xf32>,
      } else {
      }
      %c0_i32_14 = arith.constant 0 : i32
      %40 = arith.cmpi sgt, %arg2, %c0_i32_14 : i32
      %41 = arith.extui %40 : i1 to i32
      %c0_i32_15 = arith.constant 0 : i32
      %42 = arith.cmpi ne, %41, %c0_i32_15 : i32
      scf.if %42 {
        %46 = arith.index_cast %1 : i32 to index
        %c0_18 = arith.constant 0 : index
        %47 = vector.load %arg10[%46, %c0_18] : memref<128x128xf32, #tpu.memory_space<vmem>>, vector<128x128xf32>
        %48 = arith.addf %47, %36 : vector<128x128xf32>
        %49 = arith.index_cast %1 : i32 to index
        %c0_19 = arith.constant 0 : index
        %50 = vector.load %arg10[%49, %c0_19] : memref<128x128xf32, #tpu.memory_space<vmem>>, vector<128x128xf32>
        tpu.vector_store %arg10[%49, %c0_19], %48 {strides = array<i32>} : memref<128x128xf32, #tpu.memory_space<vmem>>, vector<128x128xf32>,
      } else {
      }
      %c0_i32_16 = arith.constant 0 : i32
      %43 = arith.cmpi eq, %arg2, %c0_i32_16 : i32
      %44 = arith.extui %43 : i1 to i32
      %c0_i32_17 = arith.constant 0 : i32
      %45 = arith.cmpi ne, %44, %c0_i32_17 : i32
      scf.if %45 {
        %46 = arith.index_cast %1 : i32 to index
        %c0_18 = arith.constant 0 : index
        %47 = vector.load %arg10[%46, %c0_18] : memref<128x128xf32, #tpu.memory_space<vmem>>, vector<128x128xf32>
        %c3 = arith.constant 3 : index
        %c0_19 = arith.constant 0 : index
        %48 = vector.load %arg7[%c3, %c0_19] : memref<8x128xf32, #tpu.memory_space<vmem>>, vector<1x128xf32>
        %49 = vector.broadcast %48 : vector<1x128xf32> to vector<128x128xf32>
        %50 = arith.addf %47, %49 : vector<128x128xf32>
        %51 = arith.index_cast %1 : i32 to index
        %c0_20 = arith.constant 0 : index
        %52 = vector.load %arg10[%51, %c0_20] : memref<128x128xf32, #tpu.memory_space<vmem>>, vector<128x128xf32>
        tpu.vector_store %arg10[%51, %c0_20], %50 {strides = array<i32>} : memref<128x128xf32, #tpu.memory_space<vmem>>, vector<128x128xf32>,
        %53 = vector.broadcast %11 : vector<128x1xf32> to vector<128x128xf32>
        %54 = arith.mulf %50, %53 : vector<128x128xf32>
        %cst_21 = arith.constant dense<0.000000e+00> : vector<128xf32>
        %55 = vector.multi_reduction <add>, %54, %cst_21 [0] : vector<128x128xf32> to vector<128xf32>
        %56 = vector.shape_cast %55 : vector<128xf32> to vector<1x128xf32>
        %57 = arith.mulf %54, %50 : vector<128x128xf32>
        %cst_22 = arith.constant dense<0.000000e+00> : vector<128xf32>
        %58 = vector.multi_reduction <add>, %57, %cst_22 [0] : vector<128x128xf32> to vector<128xf32>
        %59 = vector.shape_cast %58 : vector<128xf32> to vector<1x128xf32>
        %60 = tpu.concatenate %56, %59 in 0 : vector<1x128xf32>, vector<1x128xf32> -> vector<2x128xf32>
        %c2 = arith.constant 2 : index
        %c0_23 = arith.constant 0 : index
        %61 = vector.load %arg11[%c2, %c0_23] : memref<8x128xf32, #tpu.memory_space<vmem>>, vector<2x128xf32>
        %62 = arith.addf %61, %60 : vector<2x128xf32>
        %c2_24 = arith.constant 2 : index
        %c0_25 = arith.constant 0 : index
        %63 = vector.load %arg11[%c2_24, %c0_25] : memref<8x128xf32, #tpu.memory_space<vmem>>, vector<2x128xf32>
        tpu.vector_store %arg11[%c2_24, %c0_25], %62 {strides = array<i32>} : memref<8x128xf32, #tpu.memory_space<vmem>>, vector<2x128xf32>,
      } else {
      }
    } else {
    }
    %c4_i32 = arith.constant 4 : i32
    %28 = arith.cmpi eq, %arg0, %c4_i32 : i32
    %c0_i32_8 = arith.constant 0 : i32
    %29 = arith.cmpi eq, %arg2, %c0_i32_8 : i32
    %30 = arith.andi %28, %29 : i1
    %31 = arith.extui %30 : i1 to i32
    %c0_i32_9 = arith.constant 0 : i32
    %32 = arith.cmpi ne, %31, %c0_i32_9 : i32
    scf.if %32 {
      %c0_i32_10 = arith.constant 0 : i32
      %33 = arith.cmpi eq, %arg1, %c0_i32_10 : i32
      %34 = arith.extui %33 : i1 to i32
      %c0_i32_11 = arith.constant 0 : i32
      %35 = arith.cmpi ne, %34, %c0_i32_11 : i32
      scf.if %35 {
        %c2 = arith.constant 2 : index
        %c0_18 = arith.constant 0 : index
        %51 = vector.load %arg11[%c2, %c0_18] : memref<8x128xf32, #tpu.memory_space<vmem>>, vector<1x128xf32>
        %cst_19 = arith.constant 2.500000e-02 : f32
        %52 = vector.broadcast %cst_19 : f32 to vector<1x128xf32>
        %53 = arith.mulf %51, %52 : vector<1x128xf32>
        %c3 = arith.constant 3 : index
        %c0_20 = arith.constant 0 : index
        %54 = vector.load %arg11[%c3, %c0_20] : memref<8x128xf32, #tpu.memory_space<vmem>>, vector<1x128xf32>
        %cst_21 = arith.constant 2.500000e-02 : f32
        %55 = vector.broadcast %cst_21 : f32 to vector<1x128xf32>
        %56 = arith.mulf %54, %55 : vector<1x128xf32>
        %57 = arith.mulf %53, %53 : vector<1x128xf32>
        %58 = arith.subf %56, %57 : vector<1x128xf32>
        %cst_22 = arith.constant 0.000000e+00 : f32
        %59 = vector.broadcast %cst_22 : f32 to vector<1x128xf32>
        %60 = arith.maximumf %58, %59 : vector<1x128xf32>
        %c4 = arith.constant 4 : index
        %c0_23 = arith.constant 0 : index
        %61 = vector.load %arg7[%c4, %c0_23] : memref<8x128xf32, #tpu.memory_space<vmem>>, vector<1x128xf32>
        %cst_24 = arith.constant 9.99999974E-6 : f32
        %62 = vector.broadcast %cst_24 : f32 to vector<1x128xf32>
        %63 = arith.addf %60, %62 : vector<1x128xf32>
        %64 = math.rsqrt %63 : vector<1x128xf32>
        %65 = arith.mulf %61, %64 : vector<1x128xf32>
        %c6_25 = arith.constant 6 : index
        %c0_26 = arith.constant 0 : index
        %66 = vector.load %arg11[%c6_25, %c0_26] : memref<8x128xf32, #tpu.memory_space<vmem>>, vector<1x128xf32>
        tpu.vector_store %arg11[%c6_25, %c0_26], %65 {strides = array<i32>} : memref<8x128xf32, #tpu.memory_space<vmem>>, vector<1x128xf32>,
        %c5 = arith.constant 5 : index
        %c0_27 = arith.constant 0 : index
        %67 = vector.load %arg7[%c5, %c0_27] : memref<8x128xf32, #tpu.memory_space<vmem>>, vector<1x128xf32>
        %68 = arith.mulf %53, %65 : vector<1x128xf32>
        %69 = arith.subf %67, %68 : vector<1x128xf32>
        %c7_28 = arith.constant 7 : index
        %c0_29 = arith.constant 0 : index
        %70 = vector.load %arg11[%c7_28, %c0_29] : memref<8x128xf32, #tpu.memory_space<vmem>>, vector<1x128xf32>
        tpu.vector_store %arg11[%c7_28, %c0_29], %69 {strides = array<i32>} : memref<8x128xf32, #tpu.memory_space<vmem>>, vector<1x128xf32>,
      } else {
      }
      %36 = arith.index_cast %1 : i32 to index
      %c0 = arith.constant 0 : index
      %37 = vector.load %arg10[%36, %c0] : memref<128x128xf32, #tpu.memory_space<vmem>>, vector<128x128xf32>
      %c6 = arith.constant 6 : index
      %c0_12 = arith.constant 0 : index
      %38 = vector.load %arg11[%c6, %c0_12] : memref<8x128xf32, #tpu.memory_space<vmem>>, vector<1x128xf32>
      %39 = vector.broadcast %38 : vector<1x128xf32> to vector<128x128xf32>
      %40 = arith.mulf %37, %39 : vector<128x128xf32>
      %c7 = arith.constant 7 : index
      %c0_13 = arith.constant 0 : index
      %41 = vector.load %arg11[%c7, %c0_13] : memref<8x128xf32, #tpu.memory_space<vmem>>, vector<1x128xf32>
      %42 = vector.broadcast %41 : vector<1x128xf32> to vector<128x128xf32>
      %43 = arith.addf %40, %42 : vector<128x128xf32>
      %cst = arith.constant 0.000000e+00 : f32
      %44 = vector.broadcast %cst : f32 to vector<128x128xf32>
      %45 = arith.cmpf ogt, %43, %44 : vector<128x128xf32>
      %c7_14 = arith.constant 7 : index
      %c0_15 = arith.constant 0 : index
      %46 = vector.load %arg7[%c7_14, %c0_15] : memref<8x128xf32, #tpu.memory_space<vmem>>, vector<1x128xf32>
      %47 = vector.broadcast %46 : vector<1x128xf32> to vector<128x128xf32>
      %48 = arith.mulf %47, %43 : vector<128x128xf32>
      %49 = arith.select %45, %43, %48 : vector<128x128xi1>, vector<128x128xf32>
      %c0_16 = arith.constant 0 : index
      %c0_17 = arith.constant 0 : index
      %50 = vector.load %arg8[%c0_16, %c0_17] : memref<128x128xf32, #tpu.memory_space<vmem>>, vector<128x128xf32>
      tpu.vector_store %arg8[%c0_16, %c0_17], %49 {strides = array<i32>} : memref<128x128xf32, #tpu.memory_space<vmem>>, vector<128x128xf32>,
    } else {
    }
    return
  }
  func.func @transform_0(%arg0: i32, %arg1: i32, %arg2: i32) -> (i32, i32) {
    %c1_i32 = arith.constant 1 : i32
    %0 = arith.cmpi eq, %arg0, %c1_i32 : i32
    %c3_i32 = arith.constant 3 : i32
    %1 = arith.cmpi eq, %arg0, %c3_i32 : i32
    %2 = arith.ori %0, %1 : i1
    %c0_i32 = arith.constant 0 : i32
    %3 = arith.cmpi eq, %arg0, %c0_i32 : i32
    %c0_i32_0 = arith.constant 0 : i32
    %c0_i32_1 = arith.constant 0 : i32
    %4 = arith.select %3, %c0_i32_0, %c0_i32_1 : i32
    %5 = arith.select %2, %arg1, %4 : i32
    %c0_i32_2 = arith.constant 0 : i32
    %6 = arith.cmpi eq, %arg0, %c0_i32_2 : i32
    %c0_i32_3 = arith.constant 0 : i32
    %c0_i32_4 = arith.constant 0 : i32
    %7 = arith.select %6, %c0_i32_3, %c0_i32_4 : i32
    %8 = arith.select %2, %arg2, %7 : i32
    %c0_i32_5 = arith.constant 0 : i32
    return %5, %8 : i32, i32
  }
  func.func @transform_1(%arg0: i32, %arg1: i32, %arg2: i32) -> (i32, i32) {
    %c0_i32 = arith.constant 0 : i32
    %0 = arith.cmpi eq, %arg0, %c0_i32 : i32
    %c0_i32_0 = arith.constant 0 : i32
    %1 = arith.select %0, %arg1, %c0_i32_0 : i32
    %c0_i32_1 = arith.constant 0 : i32
    %c0_i32_2 = arith.constant 0 : i32
    return %1, %c0_i32_1 : i32, i32
  }
  func.func @transform_2(%arg0: i32, %arg1: i32, %arg2: i32) -> (i32, i32) {
    %c0_i32 = arith.constant 0 : i32
    %c0_i32_0 = arith.constant 0 : i32
    %c0_i32_1 = arith.constant 0 : i32
    return %c0_i32, %c0_i32_0 : i32, i32
  }
  func.func @transform_3(%arg0: i32, %arg1: i32, %arg2: i32) -> (i32, i32) {
    %c0_i32 = arith.constant 0 : i32
    %c0_i32_0 = arith.constant 0 : i32
    %c0_i32_1 = arith.constant 0 : i32
    return %c0_i32, %c0_i32_0 : i32, i32
  }
  func.func @transform_4(%arg0: i32, %arg1: i32, %arg2: i32) -> (i32, i32) {
    %c0_i32 = arith.constant 0 : i32
    %c0_i32_0 = arith.constant 0 : i32
    %c0_i32_1 = arith.constant 0 : i32
    return %c0_i32, %c0_i32_0 : i32, i32
  }
  func.func @transform_5(%arg0: i32, %arg1: i32, %arg2: i32) -> (i32, i32) {
    %c4_i32 = arith.constant 4 : i32
    %0 = arith.cmpi eq, %arg0, %c4_i32 : i32
    %c0_i32 = arith.constant 0 : i32
    %1 = arith.select %0, %arg1, %c0_i32 : i32
    %c0_i32_0 = arith.constant 0 : i32
    %c0_i32_1 = arith.constant 0 : i32
    return %1, %c0_i32_0 : i32, i32
  }
}

</mosaic_0001>

<bundles_post_ra>
// kernel: tpu_custom_call.1
= control target key start
LH: loop header
LB: loop body
LE: loop exit
PB: predicated region body
PF: predicated region fallthrough
CT: control target
= control target key end

     0   :  { %10 = vsyncpa [#allocation6], 0  ;;  %s3248_s0 = inlined_call_operand.hbm [shape: bf16[128,128], index: 0, kind: input, shape index: {}]   ;;  %s3249_s1 = inlined_call_operand.hbm [shape: bf16[128,128], index: 1, kind: input, shape index: {}]   ;;  %s3250_s2 = inlined_call_operand.hbm [shape: bf16[128,128], index: 2, kind: input, shape index: {}]   ;;  %s3251_s3 = inlined_call_operand.hbm [shape: bf16[128,128], index: 3, kind: input, shape index: {}]   ;;  %s3252_s4 = inlined_call_operand.hbm [shape: f32[8,128], index: 4, kind: input, shape index: {}]   ;;  %s3253_s5 = inlined_call_operand.hbm [shape: f32[128,128], index: 5, kind: output, shape index: {}]  }
   0x1   :  { %12 = vsyncpa [#allocation6 + $0x1], 0 }
   0x2   :  { %13 = vsyncpa [#allocation9], 0 }
   0x3   :  { %15 = vsyncpa [#allocation9 + $0x1], 0 }
   0x4   :  { %16 = vsyncpa [#allocation12], 0 }
   0x5   :  { %17 = vsyncpa [#allocation7], 0 }
   0x6   :  { %19 = vsyncpa [#allocation7 + $0x1], 0  ;;  %s2975_s18 = smov 0   ;;  %s2977_s19 = smov 0  }
   0x7   :  { %s2979_s20 = smov 0  }
   0x8 LB: > { %s2991_s21 = sadd.s32 4294967295, %s2932_s20   ;;  %s2110_s22 = sadd.s32 4294967294, %s2932_s20   ;;  %s2932_s20 = sphi %s2979_s20, %s25_s20   ;;  %s2928_s19 = sphi %s2977_s19, %s3257_s19   ;;  %s2924_s18 = sphi %s2975_s18, %s3256_s18  }
   0x9   : > { %s44_s23 = sadd.s32 1, %s2928_s19  ;;  %p2111_p0 = scmp.ge.s32.totalorder %s2932_s20, 1 }
   0xa   : > { %p46_p1 = scmp.ge.s32.totalorder %s44_s23, 5  ;;  %p210_p2 = scmp.lt.s32.totalorder %s2932_s20, 6 }
   0xb   : > { %p2651_p3 = scmp.eq.s32.totalorder %s2991_s21, 0  ;;  %s221_s27 = sshll.u32 %s3250_s2, 4  ;;  %s222_s27 = int_to_ptr.hbm [resolvable:$true] %s221_s27 }
   0xc   : > { %s3259_s23 = smov (%p46_p1, %s44_s23), 0  ;;  %p3000_p4 = pnand %p2111_p0, %p210_p2 }
   0xd   : > { %s2934_s28 = smov [#allocation10]   ;;  %s235_s8 = sshll.u32 %s3251_s3, 4  ;;  %s236_s8 = int_to_ptr.hbm [resolvable:$true] %s235_s8 }
   0xe   : > { %p2630_p5 = pneg %p3000_p4  ;;  %s223_s29 = sshll.u32 %s2934_s28, 4  ;;  %s224_s29 = int_to_ptr.vmem [resolvable:$true] %s223_s29 }
   0xf   : > { %s2935_s9 = smov 64   ;;  %s2936_s10 = smov 4  }
  0x10   : > { %p3011_p6 = pnand %p2651_p3, %p2630_p5  ;;  %s2937_s11 = smov [#allocation11]  }
  0x11   : > { %s237_s12 = sshll.u32 %s2937_s11, 4  ;;  %s250_s15 = sshll.u32 %s3252_s4, 4  ;;  %s238_s12 = int_to_ptr.vmem [resolvable:$true] %s237_s12  ;;  %s251_s15 = int_to_ptr.hbm [resolvable:$true] %s250_s15 }
  0x12   : > { %2633 = dma.hbm_to_vmem [thread:$0]  (!%p3011_p6), %s222_s27, 1024, %s224_s29, [#allocation9], %s2935_s9, %s2935_s9, %s2936_s10  }
  0x13   : > { %2636 = dma.hbm_to_vmem [thread:$0]  (!%p3011_p6), %s236_s8, 1024, %s238_s12, [#allocation12], %s2935_s9, %s2935_s9, %s2936_s10  }
  0x14   : > { %p2654_p7 = scmp.lt.s32.totalorder %s2932_s20, 5  ;;  %s2938_s16 = smov [#allocation13]  }
  0x15   : > { %s252_s17 = sshll.u32 %s2938_s16, 4  ;;  %p2655_p8 = scmp.eq.s32.totalorder %s2932_s20, 0  ;;  %s253_s17 = int_to_ptr.vmem [resolvable:$true] %s252_s17 }
  0x16   : > { %s279_s27 = sshll.u32 %s3248_s0, 4  ;;  %s2939_s28 = smov [#allocation5]   ;;  %s280_s27 = int_to_ptr.hbm [resolvable:$true] %s279_s27 }
  0x17   : > { %2639 = dma.hbm_to_vmem [thread:$0]  (!%p3011_p6), %s251_s15, 128, %s253_s17, [#allocation12]  }
  0x18   : > { %s281_s29 = sshll.u32 %s2939_s28, 4  ;;  %p2641_p9 = pnand %p2655_p8, %p2654_p7  ;;  %s282_s29 = int_to_ptr.vmem [resolvable:$true] %s281_s29 }
  0x19   : > { %s291_s6 = sand.u32 1, %s2932_s20   ;;  %s303_s11 = sshll.u32 %s3249_s1, 4  ;;  %s304_s11 = int_to_ptr.hbm [resolvable:$true] %s303_s11 }
  0x1a   : > { %2643 = dma.hbm_to_vmem [thread:$0]  (!%p2641_p9), %s280_s27, 1024, %s282_s29, [#allocation6], %s2935_s9, %s2935_s9, %s2936_s10  }
  0x1b   : > { %s2940_s12 = smov [#allocation8]   ;;  %s292_s30 = scalar_lea.sflag [#allocation9], %s291_s6 }
  0x1c   : > { %s305_s13 = sshll.u32 %s2940_s12, 4  ;;  %317 = sbr.rel (%p3000_p4) target bundleno = 999 (0x3e7), region = 40  ;;  %s306_s13 = int_to_ptr.vmem [resolvable:$true] %s305_s13 }
  0x1d   : > { %2646 = dma.hbm_to_vmem [thread:$0]  (!%p2641_p9), %s304_s11, 1024, %s306_s13, %s292_s30, %s2935_s9, %s2935_s9, %s2936_s10  }
  0x21   : > { %2903 = dma.done.wait (%p2651_p3), [#allocation6], 1024  }
  0x22   : > { %2905 = vsyncadd (%p2651_p3), [#allocation6], 4294966272  ;;  %s329_s14 = sand.u32 1, %s2991_s21  }
  0x23   : > { %s330_s15 = scalar_lea.sflag [#allocation9], %s329_s14 }
  0x24   : > { %2907 = dma.done.wait (%p2651_p3), %s330_s15, 1024  }
  0x25   : > { %2909 = vsyncadd (%p2651_p3), %s330_s15, 4294966272 }
  0x26   : > { %2911 = dma.done.wait (%p2651_p3), [#allocation9], 1024  }
  0x27   : > { %2913 = vsyncadd (%p2651_p3), [#allocation9], 4294966272 }
  0x28   : > { %2915 = dma.done.wait (%p2651_p3), [#allocation12], 1152  }
  0x29   : > { %2917 = vsyncadd (%p2651_p3), [#allocation12], 4294966144  ;;  %p477_p10 = scmp.eq.s32.totalorder %s2924_s18, 0 }
  0x2a   : > { %v2373_v0 = vld [vmem:[#allocation10 + $0x38] sm:$0xff] (%p477_p10)  ;;  %v2941_v1 = vmov (%p477_p10), 0.0   ;;  %v2372_v2 = vld [vmem:[#allocation10 + $0x30] sm:$0xff] (%p477_p10)  ;;  %v2371_v3 = vld [vmem:[#allocation10 + $0x28] sm:$0xff] (%p477_p10) }
  0x2b   : > { %482 = sbr.rel (!%p477_p10) target bundleno = 235 (0xeb), region = 64  ;;  %487 = vst [vmem:[#allocation4] sm:$0xff] (%p477_p10), %v2941_v1  ;;  %616 = vmatpush.bf16.msra.mxu0 (%p477_p10), %v2373_v0  ;;  %2510 = vmatpush.bf16.msra.mxu1 (%p477_p10), %v2373_v0  ;;  %v2370_v4 = vld [vmem:[#allocation10 + $0x20] sm:$0xff] (%p477_p10)  ;;  %v2369_v5 = vld [vmem:[#allocation10 + $0x18] sm:$0xff] (%p477_p10)  ;;  %v2368_v6 = vld [vmem:[#allocation10 + $0x10] sm:$0xff] (%p477_p10) }
  0x2c   : > { %2511 = vmatpush.bf16.msra.mxu2 (%p477_p10), %v2373_v0  ;;  %2512 = vmatpush.bf16.msra.mxu3 (%p477_p10), %v2373_v0  ;;  %v2367_v7 = vld [vmem:[#allocation10 + $0x8] sm:$0xff] (%p477_p10)  ;;  %v2366_v8 = vld [vmem:[#allocation10] sm:$0xff] (%p477_p10)  ;;  %v2360_v10 = vld [vmem:[#allocation8 + $0x10] sm:$0xff] (%p477_p10) }
  0x2d   : > { %v2358_v9 = vld [vmem:[#allocation8] sm:$0xff] (%p477_p10)  ;;  %v2364_v12 = vld [vmem:[#allocation8 + $0x30] sm:$0xff] (%p477_p10)  ;;  %v2359_v13 = vld [vmem:[#allocation8 + $0x8] sm:$0xff] (%p477_p10) }
  0x2e   : > { %v2362_v11 = vld [vmem:[#allocation8 + $0x20] sm:$0xff] (%p477_p10)  ;;  %v2361_v14 = vld [vmem:[#allocation8 + $0x18] sm:$0xff] (%p477_p10)  ;;  %v2363_v15 = vld [vmem:[#allocation8 + $0x28] sm:$0xff] (%p477_p10) }
  0x2f   : > { %617 = vmatpush.bf16.msra.mxu0 (%p477_p10), %v2372_v2  ;;  %2513 = vmatpush.bf16.msra.mxu1 (%p477_p10), %v2372_v2  ;;  %v2365_v16 = vld [vmem:[#allocation8 + $0x38] sm:$0xff] (%p477_p10) }
  0x30   : > { %2514 = vmatpush.bf16.msra.mxu2 %v2372_v2  ;;  %2515 = vmatpush.bf16.msra.mxu3 %v2372_v2 }
  0x33   : > { %618 = vmatpush.bf16.msra.mxu0 %v2371_v3  ;;  %2516 = vmatpush.bf16.msra.mxu1 %v2371_v3 }
  0x34   : > { %2517 = vmatpush.bf16.msra.mxu2 %v2371_v3  ;;  %2518 = vmatpush.bf16.msra.mxu3 %v2371_v3 }
  0x37   : > { %619 = vmatpush.bf16.msra.mxu0 %v2370_v4  ;;  %2519 = vmatpush.bf16.msra.mxu1 %v2370_v4 }
  0x38   : > { %2520 = vmatpush.bf16.msra.mxu2 %v2370_v4  ;;  %2521 = vmatpush.bf16.msra.mxu3 %v2370_v4 }
  0x3b   : > { %620 = vmatpush.bf16.msra.mxu0 %v2369_v5  ;;  %2522 = vmatpush.bf16.msra.mxu1 %v2369_v5 }
  0x3c   : > { %2523 = vmatpush.bf16.msra.mxu2 %v2369_v5  ;;  %2524 = vmatpush.bf16.msra.mxu3 %v2369_v5 }
  0x3f   : > { %621 = vmatpush.bf16.msra.mxu0 %v2368_v6  ;;  %2525 = vmatpush.bf16.msra.mxu1 %v2368_v6 }
  0x40   : > { %2526 = vmatpush.bf16.msra.mxu2 %v2368_v6  ;;  %2527 = vmatpush.bf16.msra.mxu3 %v2368_v6 }
  0x43   : > { %622 = vmatpush.bf16.msra.mxu0 %v2367_v7  ;;  %2528 = vmatpush.bf16.msra.mxu1 %v2367_v7 }
  0x44   : > { %2529 = vmatpush.bf16.msra.mxu2 %v2367_v7  ;;  %2530 = vmatpush.bf16.msra.mxu3 %v2367_v7 }
  0x47   : > { %623 = vmatpush.bf16.msra.mxu0 %v2366_v8  ;;  %2531 = vmatpush.bf16.msra.mxu1 %v2366_v8 }
  0x48   : > { %2532 = vmatpush.bf16.msra.mxu2 %v2366_v8  ;;  %2533 = vmatpush.bf16.msra.mxu3 %v2366_v8 }
  0x4a   : > { %624 = vmatmul.bf16.vlgmr.msra.gmra.mxu0 %v2358_v9  ;;  %634 = vmatmul.bf16.vlgmr.msra.gmra.mxu1 %v2360_v10 }
  0x4b   : > { %644 = vmatmul.bf16.vlgmr.msra.gmra.mxu2 %v2362_v11  ;;  %654 = vmatmul.bf16.vlgmr.msra.gmra.mxu3 %v2364_v12 }
  0x5a   : > { %629 = vmatmul.bf16.gmra.mxu0 %v2359_v13  ;;  %639 = vmatmul.bf16.gmra.mxu1 %v2361_v14 }
  0x5b   : > { %649 = vmatmul.bf16.gmra.mxu2 %v2363_v15  ;;  %659 = vmatmul.bf16.gmra.mxu3 %v2365_v16 }
  0xc7   : > { %v625_v17 = vpop.f32.mrf.mxu0  ;;  %v635_v18 = vpop.f32.mrf.mxu1 }
  0xce   : > { %v645_v19 = vpop.f32.mrf.mxu2  ;;  %v655_v20 = vpop.f32.mrf.mxu3 }
  0xcf   : > { %v627_v21 = vpop.f32.mrf.mxu0  ;;  %v637_v22 = vpop.f32.mrf.mxu1 }
  0xd0   : > { %v2419_v23 = vpack.c.bf16 %v627_v21, %v625_v17  ;;  %v2429_v24 = vpack.c.bf16 %v637_v22, %v635_v18 }
  0xd2   : > { %2420 = vst [vmem:[#allocation2 + $0x30] sm:$0xff] %v2419_v23  }
  0xd3   : > { %2497 = vst [vmem:[#allocation2 + $0x18] sm:$0xff] %v2429_v24  }
  0xd6   : > { %v647_v25 = vpop.f32.mrf.mxu2  ;;  %v657_v26 = vpop.f32.mrf.mxu3 }
  0xd7   : > { %v2439_v27 = vpack.c.bf16 %v647_v25, %v645_v19  ;;  %v2449_v28 = vpack.c.bf16 %v657_v26, %v655_v20  ;;  %v630_v29 = vpop.f32.mrf.mxu0  ;;  %v640_v30 = vpop.f32.mrf.mxu1 }
  0xd9   : > { %2499 = vst [vmem:[#allocation2 + $0x8] sm:$0xff] %v2439_v27  }
  0xda   : > { %2501 = vst [vmem:[#allocation2 + $0x28] sm:$0xff] %v2449_v28  }
  0xde   : > { %v650_v31 = vpop.f32.mrf.mxu2  ;;  %v660_v32 = vpop.f32.mrf.mxu3 }
  0xdf   : > { %v632_v33 = vpop.f32.mrf.mxu0  ;;  %v642_v34 = vpop.f32.mrf.mxu1 }
  0xe0   : > { %v2424_v35 = vpack.c.bf16 %v632_v33, %v630_v29  ;;  %v2434_v36 = vpack.c.bf16 %v642_v34, %v640_v30 }
  0xe2   : > { %2496 = vst [vmem:[#allocation2] sm:$0xff] %v2424_v35  }
  0xe3   : > { %2498 = vst [vmem:[#allocation2 + $0x10] sm:$0xff] %v2434_v36  }
  0xe6   : > { %v652_v37 = vpop.f32.mrf.mxu2  ;;  %v662_v38 = vpop.f32.mrf.mxu3 }
  0xe7   : > { %v2444_v39 = vpack.c.bf16 %v652_v37, %v650_v31  ;;  %v2454_v40 = vpack.c.bf16 %v662_v38, %v660_v32 }
  0xe9   : > { %2500 = vst [vmem:[#allocation2 + $0x20] sm:$0xff] %v2444_v39  }
  0xea   : > { %2502 = vst [vmem:[#allocation2 + $0x38] sm:$0xff] %v2454_v40  }
  0xeb PF: > { %p2189_p11 = scmp.ne.s32.totalorder %s2924_s18, 1 }
  0xed   : > { %704 = sbr.rel (%p2189_p11) target bundleno = 470 (0x1d6), region = 72 }
  0xf2   : > { %v2389_v41 = vld [vmem:[#allocation2 + $0x38] sm:$0xff]  ;;  %v2388_v42 = vld [vmem:[#allocation2 + $0x28] sm:$0xff]  ;;  %v2387_v43 = vld [vmem:[#allocation2 + $0x20] sm:$0xff]  ;;  %vm1087_vm0 = vcmask 1040384  }
  0xf3   : > { %837 = vmatpush.bf16.msra.mxu0 %v2389_v41  ;;  %2534 = vmatpush.bf16.msra.mxu1 %v2389_v41  ;;  %v2386_v44 = vld [vmem:[#allocation2 + $0x8] sm:$0xff]  ;;  %v2385_v45 = vld [vmem:[#allocation2 + $0x10] sm:$0xff]  ;;  %v2384_v46 = vld [vmem:[#allocation2 + $0x18] sm:$0xff] }
  0xf4   : > { %2535 = vmatpush.bf16.msra.mxu2 %v2389_v41  ;;  %2536 = vmatpush.bf16.msra.mxu3 %v2389_v41  ;;  %v2383_v47 = vld [vmem:[#allocation2] sm:$0xff]  ;;  %v2382_v48 = vld [vmem:[#allocation2 + $0x30] sm:$0xff]  ;;  %v2374_v49 = vld [vmem:[#allocation5] sm:$0xff] }
  0xf5   : > { %v2376_v50 = vld [vmem:[#allocation5 + $0x10] sm:$0xff]  ;;  %v2378_v51 = vld [vmem:[#allocation5 + $0x20] sm:$0xff]  ;;  %v2375_v53 = vld [vmem:[#allocation5 + $0x8] sm:$0xff] }
  0xf6   : > { %v2380_v52 = vld [vmem:[#allocation5 + $0x30] sm:$0xff]  ;;  %v2377_v54 = vld [vmem:[#allocation5 + $0x18] sm:$0xff]  ;;  %v2379_v55 = vld [vmem:[#allocation5 + $0x28] sm:$0xff] }
  0xf7   : > { %838 = vmatpush.bf16.msra.mxu0 %v2388_v42  ;;  %2537 = vmatpush.bf16.msra.mxu1 %v2388_v42  ;;  %v2381_v56 = vld [vmem:[#allocation5 + $0x38] sm:$0xff]  ;;  %v3069_v57 = vld [vmem:[#allocation13] ss:$0 sm:$0xff] }
  0xf8   : > { %2538 = vmatpush.bf16.msra.mxu2 %v2388_v42  ;;  %2539 = vmatpush.bf16.msra.mxu3 %v2388_v42 }
  0xfb   : > { %839 = vmatpush.bf16.msra.mxu0 %v2387_v43  ;;  %2540 = vmatpush.bf16.msra.mxu1 %v2387_v43 }
  0xfc   : > { %2541 = vmatpush.bf16.msra.mxu2 %v2387_v43  ;;  %2542 = vmatpush.bf16.msra.mxu3 %v2387_v43 }
  0xff   : > { %840 = vmatpush.bf16.msra.mxu0 %v2386_v44  ;;  %2543 = vmatpush.bf16.msra.mxu1 %v2386_v44 }
 0x100   : > { %2544 = vmatpush.bf16.msra.mxu2 %v2386_v44  ;;  %2545 = vmatpush.bf16.msra.mxu3 %v2386_v44 }
 0x103   : > { %841 = vmatpush.bf16.msra.mxu0 %v2385_v45  ;;  %2546 = vmatpush.bf16.msra.mxu1 %v2385_v45 }
 0x104   : > { %2547 = vmatpush.bf16.msra.mxu2 %v2385_v45  ;;  %2548 = vmatpush.bf16.msra.mxu3 %v2385_v45 }
 0x107   : > { %842 = vmatpush.bf16.msra.mxu0 %v2384_v46  ;;  %2549 = vmatpush.bf16.msra.mxu1 %v2384_v46 }
 0x108   : > { %2550 = vmatpush.bf16.msra.mxu2 %v2384_v46  ;;  %2551 = vmatpush.bf16.msra.mxu3 %v2384_v46 }
 0x10b   : > { %843 = vmatpush.bf16.msra.mxu0 %v2383_v47  ;;  %2552 = vmatpush.bf16.msra.mxu1 %v2383_v47 }
 0x10c   : > { %2553 = vmatpush.bf16.msra.mxu2 %v2383_v47  ;;  %2554 = vmatpush.bf16.msra.mxu3 %v2383_v47 }
 0x10f   : > { %844 = vmatpush.bf16.msra.mxu0 %v2382_v48  ;;  %2555 = vmatpush.bf16.msra.mxu1 %v2382_v48 }
 0x110   : > { %2556 = vmatpush.bf16.msra.mxu2 %v2382_v48  ;;  %2557 = vmatpush.bf16.msra.mxu3 %v2382_v48 }
 0x112   : > { %845 = vmatmul.bf16.vlgmr.msra.gmra.mxu0 %v2374_v49  ;;  %855 = vmatmul.bf16.vlgmr.msra.gmra.mxu1 %v2376_v50 }
 0x113   : > { %865 = vmatmul.bf16.vlgmr.msra.gmra.mxu2 %v2378_v51  ;;  %875 = vmatmul.bf16.vlgmr.msra.gmra.mxu3 %v2380_v52 }
 0x122   : > { %850 = vmatmul.bf16.gmra.mxu0 %v2375_v53  ;;  %860 = vmatmul.bf16.gmra.mxu1 %v2377_v54 }
 0x123   : > { %870 = vmatmul.bf16.gmra.mxu2 %v2379_v55  ;;  %880 = vmatmul.bf16.gmra.mxu3 %v2381_v56 }
 0x18f   : > { %v846_v58 = vpop.f32.mrf.mxu0  ;;  %v856_v59 = vpop.f32.mrf.mxu1 }
 0x190   : > { %v981_v60 = vadd.f32 %v3069_v57, %v846_v58  ;;  %v985_v61 = vadd.f32 %v3069_v57, %v856_v59 }
 0x192   : > { %997 = vst [vmem:[#allocation3] sm:$0xff] %v981_v60  ;;  %v1050_v15 = vmul.f32 %v981_v60, %v981_v60  ;;  %v1054_v32 = vmul.f32 %v985_v61, %v985_v61 }
 0x193   : > { %1001 = vst [vmem:[#allocation3 + $0x68] sm:$0xff] %v985_v61 }
 0x196   : > { %v866_v62 = vpop.f32.mrf.mxu2  ;;  %v876_v63 = vpop.f32.mrf.mxu3 }
 0x197   : > { %v3074_v0 = vadd.f32 %v3069_v57, %v866_v62  ;;  %v848_v1 = vpop.f32.mrf.mxu0  ;;  %v858_v2 = vpop.f32.mrf.mxu1  ;;  %v3080_v5 = vadd.f32 %v3069_v57, %v876_v63 }
 0x198   : > { %v982_v3 = vadd.f32 %v3069_v57, %v848_v1  ;;  %v986_v4 = vadd.f32 %v3069_v57, %v858_v2 }
 0x199   : > { %1005 = vst [vmem:[#allocation3 + $0x28] sm:$0xff] %v3074_v0  ;;  %v1021_v42 = vmul.f32 0.0, %v3074_v0 }
 0x19a   : > { %998 = vst [vmem:[#allocation3 + $0x18] sm:$0xff] %v982_v3  ;;  %v1051_v14 = vmul.f32 %v982_v3, %v982_v3  ;;  %v1029_v16 = vadd.f32 %v982_v3, %v981_v60  ;;  %v1018_v27 = vmul.f32 0.0, %v986_v4 }
 0x19b   : > { %1002 = vst [vmem:[#allocation3 + $0x20] sm:$0xff] %v986_v4  ;;  %v1058_v52 = vmul.f32 %v1021_v42, %v3074_v0 }
 0x19c   : > { %1009 = vst [vmem:[#allocation3 + $0x58] sm:$0xff] %v3080_v5  ;;  %v1066_v23 = vadd.f32 %v1051_v14, %v1050_v15  ;;  %v1055_v36 = vmul.f32 %v1018_v27, %v986_v4 }
 0x19e   : > { %v868_v6 = vpop.f32.mrf.mxu2  ;;  %v878_v7 = vpop.f32.mrf.mxu3 }
 0x19f   : > { %v990_v8 = vadd.f32 %v3069_v57, %v868_v6  ;;  %v851_v9 = vpop.f32.mrf.mxu0  ;;  %v861_v10 = vpop.f32.mrf.mxu1  ;;  %v3087_v13 = vadd.f32 %v3069_v57, %v878_v7 }
 0x1a0   : > { %v983_v11 = vadd.f32 %v3069_v57, %v851_v9  ;;  %v987_v12 = vadd.f32 %v3069_v57, %v861_v10 }
 0x1a1   : > { %1006 = vst [vmem:[#allocation3 + $0x40] sm:$0xff] %v990_v8  ;;  %v1022_v48 = vmul.f32 0.0, %v990_v8  ;;  %v1026_v1 = vmul.f32 0.0, %v3087_v13 }
 0x1a2   : > { %999 = vst [vmem:[#allocation3 + $0x50] sm:$0xff] %v983_v11  ;;  %v1052_v17 = vmul.f32 %v983_v11, %v983_v11  ;;  %v1030_v24 = vadd.f32 %v1029_v16, %v983_v11  ;;  %v1019_v33 = vmul.f32 0.0, %v987_v12 }
 0x1a3   : > { %1003 = vst [vmem:[#allocation3 + $0x70] sm:$0xff] %v987_v12  ;;  %v1059_v56 = vmul.f32 %v1022_v48, %v990_v8  ;;  %v1063_v8 = vmul.f32 %v1026_v1, %v3087_v13 }
 0x1a4   : > { %1010 = vst [vmem:[#allocation3 + $0x48] sm:$0xff] %v3087_v13  ;;  %v1067_v28 = vadd.f32 %v1066_v23, %v1052_v17  ;;  %v1056_v44 = vmul.f32 %v1019_v33, %v987_v12 }
 0x1a6   : > { %v871_v18 = vpop.f32.mrf.mxu2  ;;  %v881_v19 = vpop.f32.mrf.mxu3 }
 0x1a7   : > { %v991_v20 = vadd.f32 %v3069_v57, %v871_v18  ;;  %v853_v21 = vpop.f32.mrf.mxu0  ;;  %v863_v22 = vpop.f32.mrf.mxu1  ;;  %v995_v31 = vadd.f32 %v3069_v57, %v881_v19 }
 0x1a8   : > { %v984_v25 = vadd.f32 %v3069_v57, %v853_v21  ;;  %v988_v26 = vadd.f32 %v3069_v57, %v863_v22 }
 0x1a9   : > { %1007 = vst [vmem:[#allocation3 + $0x38] sm:$0xff] %v991_v20  ;;  %v1023_v53 = vmul.f32 0.0, %v991_v20  ;;  %v1027_v0 = vmul.f32 0.0, %v995_v31 }
 0x1aa   : > { %1000 = vst [vmem:[#allocation3 + $0x60] sm:$0xff] %v984_v25  ;;  %v1031_v29 = vadd.f32 %v1030_v24, %v984_v25  ;;  %v1053_v30 = vmul.f32 %v984_v25, %v984_v25  ;;  %v1020_v39 = vmul.f32 0.0, %v988_v26 }
 0x1ab   : > { %1004 = vst [vmem:[#allocation3 + $0x10] sm:$0xff] %v988_v26  ;;  %v1060_v62 = vmul.f32 %v1023_v53, %v991_v20  ;;  %v1064_v14 = vmul.f32 %v1027_v0, %v995_v31 }
 0x1ac   : > { %v1032_v34 = vadd.f32 %v1031_v29, %v985_v61  ;;  %v1068_v35 = vadd.f32 %v1067_v28, %v1053_v30  ;;  %1011 = vst [vmem:[#allocation3 + $0x78] sm:$0xff] %v995_v31  ;;  %v1057_v50 = vmul.f32 %v1020_v39, %v988_v26  ;;  %v1025_v61 = vmul.f32 0.0, %v3080_v5  ;;  %v1089_v31 = vld [vmem:[#allocation4] sm:$0x3] }
 0x1ae   : > { %v1033_v37 = vadd.f32 %v1032_v34, %v1018_v27  ;;  %v1069_v38 = vadd.f32 %v1068_v35, %v1054_v32  ;;  %v873_v40 = vpop.f32.mrf.mxu2  ;;  %v883_v41 = vpop.f32.mrf.mxu3  ;;  %v1062_v6 = vmul.f32 %v1025_v61, %v3080_v5 }
 0x1af   : > { %v992_v43 = vadd.f32 %v3069_v57, %v873_v40  ;;  %v996_v47 = vadd.f32 %v3069_v57, %v883_v41 }
 0x1b0   : > { %v1034_v45 = vadd.f32 %v1033_v37, %v1019_v33  ;;  %v1070_v46 = vadd.f32 %v1069_v38, %v1055_v36 }
 0x1b1   : > { %1008 = vst [vmem:[#allocation3 + $0x8] sm:$0xff] %v992_v43  ;;  %v1024_v59 = vmul.f32 0.0, %v992_v43  ;;  %v1028_v11 = vmul.f32 0.0, %v996_v47 }
 0x1b2   : > { %v1035_v49 = vadd.f32 %v1034_v45, %v1020_v39  ;;  %v1071_v51 = vadd.f32 %v1070_v46, %v1056_v44  ;;  %1012 = vst [vmem:[#allocation3 + $0x30] sm:$0xff] %v996_v47 }
 0x1b3   : > { %v1061_v3 = vmul.f32 %v1024_v59, %v992_v43  ;;  %v1065_v18 = vmul.f32 %v1028_v11, %v996_v47 }
 0x1b4   : > { %v1036_v54 = vadd.f32 %v1035_v49, %v1021_v42  ;;  %v1072_v55 = vadd.f32 %v1071_v51, %v1057_v50 }
 0x1b6   : > { %v1073_v58 = vadd.f32 %v1072_v55, %v1058_v52  ;;  %v1037_v60 = vadd.f32 %v1036_v54, %v1022_v48 }
 0x1b8   : > { %v1038_v63 = vadd.f32 %v1037_v60, %v1023_v53  ;;  %v1074_v57 = vadd.f32 %v1073_v58, %v1059_v56 }
 0x1ba   : > { %v1039_v2 = vadd.f32 %v1038_v63, %v1024_v59  ;;  %v1075_v4 = vadd.f32 %v1074_v57, %v1060_v62 }
 0x1bc   : > { %v1040_v7 = vadd.f32 %v1039_v2, %v1025_v61  ;;  %v1076_v9 = vadd.f32 %v1075_v4, %v1061_v3 }
 0x1be   : > { %v1077_v10 = vadd.f32 %v1076_v9, %v1062_v6  ;;  %v1041_v12 = vadd.f32 %v1040_v7, %v1026_v1 }
 0x1c0   : > { %v1042_v15 = vadd.f32 %v1041_v12, %v1027_v0  ;;  %v1078_v16 = vadd.f32 %v1077_v10, %v1063_v8 }
 0x1c2   : > { %v1043_v17 = vadd.f32 %v1042_v15, %v1028_v11  ;;  %v1079_v19 = vadd.f32 %v1078_v16, %v1064_v14 }
 0x1c4   : > { %v1044_v20 = vrot.slane %v1043_v17, 4  ;;  %v1080_v21 = vadd.f32 %v1079_v19, %v1065_v18 }
 0x1c6   : > { %v1045_v22 = vadd.f32 %v1044_v20, %v1043_v17  ;;  %v1081_v23 = vrot.slane %v1080_v21, 4 }
 0x1c8   : > { %v1046_v24 = vrot.slane %v1045_v22, 2  ;;  %v1082_v5 = vadd.f32 %v1081_v23, %v1080_v21 }
 0x1ca   : > { %v1047_v25 = vadd.f32 %v1046_v24, %v1045_v22  ;;  %v1083_v26 = vrot.slane %v1082_v5, 2 }
 0x1cc   : > { %v1048_v27 = vrot.slane %v1047_v25, 1  ;;  %v1084_v28 = vadd.f32 %v1083_v26, %v1082_v5 }
 0x1ce   : > { %v1085_v13 = vrot.slane %v1084_v28, 1  ;;  %v1049_v29 = vadd.f32 %v1048_v27, %v1047_v25 }
 0x1d0   : > { %v1086_v30 = vadd.f32 %v1085_v13, %v1084_v28 }
 0x1d2   : > { %v1088_v32 = vsel %vm1087_vm0, %v1049_v29, %v1086_v30 }
 0x1d3   : > { %v1090_v33 = vadd.f32 %v1089_v31, %v1088_v32 }
 0x1d5   : > { %1091 = vst [vmem:[#allocation4] sm:$0x3] %v1090_v33 }
 0x1d6 PF: > { %p1092_p12 = scmp.eq.s32.totalorder %s2924_s18, 2 }
 0x1d7   : > { %v2398_v34 = vld [vmem:[#allocation11 + $0x38] sm:$0xff] (%p1092_p12)  ;;  %v2397_v35 = vld [vmem:[#allocation11 + $0x30] sm:$0xff] (%p1092_p12)  ;;  %v2396_v41 = vld [vmem:[#allocation11 + $0x28] sm:$0xff] (%p1092_p12) }
 0x1d8   : > { %1096 = sbr.rel (!%p1092_p12) target bundleno = 690 (0x2b2), region = 88  ;;  %1301 = vmatpush.bf16.msra.mxu0 (%p1092_p12), %v2398_v34  ;;  %2558 = vmatpush.bf16.msra.mxu1 (%p1092_p12), %v2398_v34  ;;  %v2395_v44 = vld [vmem:[#allocation11 + $0x20] sm:$0xff] (%p1092_p12)  ;;  %v2394_v46 = vld [vmem:[#allocation11 + $0x18] sm:$0xff] (%p1092_p12)  ;;  %v2393_v47 = vld [vmem:[#allocation11 + $0x10] sm:$0xff] (%p1092_p12) }
 0x1d9   : > { %2559 = vmatpush.bf16.msra.mxu2 (%p1092_p12), %v2398_v34  ;;  %2560 = vmatpush.bf16.msra.mxu3 (%p1092_p12), %v2398_v34  ;;  %v2392_v50 = vld [vmem:[#allocation11 + $0x8] sm:$0xff] (%p1092_p12)  ;;  %v2391_v53 = vld [vmem:[#allocation11] sm:$0xff] (%p1092_p12)  ;;  %v1127_v63 = vld [vmem:[#allocation3] sm:$0xff] (%p1092_p12) }
 0x1da   : > { %v1108_v55 = vld [vmem:[#allocation13 + $0x1] sm:$0x1] (%p1092_p12)  ;;  %v1122_v60 = vld [vmem:[#allocation13 + $0x2] sm:$0x1] (%p1092_p12)  ;;  %v1128_v57 = vld [vmem:[#allocation3 + $0x18] sm:$0xff] (%p1092_p12) }
 0x1db   : > { %v1131_v1 = vld [vmem:[#allocation3 + $0x68] sm:$0xff] (%p1092_p12)  ;;  %v1132_v2 = vld [vmem:[#allocation3 + $0x20] sm:$0xff] (%p1092_p12)  ;;  %v1139_v6 = vld [vmem:[#allocation3 + $0x58] sm:$0xff] (%p1092_p12) }
 0x1dc   : > { %v1101_v36 = vld [vmem:[#allocation4] sm:$0x1] (%p1092_p12)  ;;  %v1103_v38 = vld [vmem:[#allocation4 + $0x1] sm:$0x1] (%p1092_p12)  ;;  %1302 = vmatpush.bf16.msra.mxu0 (%p1092_p12), %v2397_v35  ;;  %2561 = vmatpush.bf16.msra.mxu1 (%p1092_p12), %v2397_v35  ;;  %v1135_v3 = vld [vmem:[#allocation3 + $0x28] sm:$0xff] (%p1092_p12) }
 0x1dd   : > { %v1102_v37 = vmul.f32 0.025, %v1101_v36  ;;  %v1104_v39 = vmul.f32 0.025, %v1103_v38  ;;  %2562 = vmatpush.bf16.msra.mxu2 %v2397_v35  ;;  %2563 = vmatpush.bf16.msra.mxu3 %v2397_v35  ;;  %v1136_v4 = vld [vmem:[#allocation3 + $0x40] sm:$0xff]  ;;  %v1140_v7 = vld [vmem:[#allocation3 + $0x48] sm:$0xff] }
 0x1de   : > { %v1129_v9 = vld [vmem:[#allocation3 + $0x50] sm:$0xff]  ;;  %v1130_v8 = vld [vmem:[#allocation3 + $0x60] sm:$0xff]  ;;  %v1137_v17 = vld [vmem:[#allocation3 + $0x38] sm:$0xff] }
 0x1df   : > { %v1105_v40 = vmul.f32 %v1102_v37, %v1102_v37  ;;  %v1133_v10 = vld [vmem:[#allocation3 + $0x70] sm:$0xff]  ;;  %v1138_v18 = vld [vmem:[#allocation3 + $0x8] sm:$0xff] }
 0x1e0   : > { %1303 = vmatpush.bf16.msra.mxu0 %v2396_v41  ;;  %2564 = vmatpush.bf16.msra.mxu1 %v2396_v41  ;;  %v1134_v16 = vld [vmem:[#allocation3 + $0x10] sm:$0xff]  ;;  %v3115_v24 = vld [vmem:[#allocation13 + $0x6] ss:$0 sm:$0xff] }
 0x1e1   : > { %v1106_v42 = vsub.f32 %v1104_v39, %v1105_v40  ;;  %2565 = vmatpush.bf16.msra.mxu2 %v2396_v41  ;;  %2566 = vmatpush.bf16.msra.mxu3 %v2396_v41 }
 0x1e3   : > { %v1107_v43 = vmax.f32 %v1106_v42, 0.0 }
 0x1e4   : > { %1304 = vmatpush.bf16.msra.mxu0 %v2395_v44  ;;  %2567 = vmatpush.bf16.msra.mxu1 %v2395_v44 }
 0x1e5   : > { %v1109_v45 = vadd.f32 1e-05, %v1107_v43  ;;  %2568 = vmatpush.bf16.msra.mxu2 %v2395_v44  ;;  %2569 = vmatpush.bf16.msra.mxu3 %v2395_v44 }
 0x1e7   : > { %2704 = vrsqrt.f32 %v1109_v45  ;;  %vm1116_vm1 = vweird.f32 %v1109_v45 }
 0x1e8   : > { %1305 = vmatpush.bf16.msra.mxu0 %v2394_v46  ;;  %2570 = vmatpush.bf16.msra.mxu1 %v2394_v46 }
 0x1e9   : > { %2571 = vmatpush.bf16.msra.mxu2 %v2394_v46  ;;  %2572 = vmatpush.bf16.msra.mxu3 %v2394_v46 }
 0x1ec   : > { %1306 = vmatpush.bf16.msra.mxu0 %v2393_v47  ;;  %2573 = vmatpush.bf16.msra.mxu1 %v2393_v47 }
 0x1ed   : > { %v2705_v48 = vpop.eup %2704  ;;  %2574 = vmatpush.bf16.msra.mxu2 %v2393_v47  ;;  %2575 = vmatpush.bf16.msra.mxu3 %v2393_v47 }
 0x1ee   : > { %v1111_v49 = vmul.f32 %v2705_v48, %v1109_v45  ;;  %vm1117_vm2 = vweird.f32 %v2705_v48 }
 0x1ef   : > { %vm1118_vm3 = vmor %vm1116_vm1, %vm1117_vm2 }
 0x1f0   : > { %v1112_v51 = vmul.f32 %v2705_v48, %v1111_v49  ;;  %1307 = vmatpush.bf16.msra.mxu0 %v2392_v50  ;;  %2576 = vmatpush.bf16.msra.mxu1 %v2392_v50  ;;  %v1141_v49 = vld [vmem:[#allocation3 + $0x78] sm:$0xff] }
 0x1f1   : > { %2577 = vmatpush.bf16.msra.mxu2 %v2392_v50  ;;  %2578 = vmatpush.bf16.msra.mxu3 %v2392_v50 }
 0x1f2   : > { %v1113_v52 = vmul.f32 0.5, %v1112_v51 }
 0x1f4   : > { %v1114_v54 = vsub.f32 1.5, %v1113_v52  ;;  %1308 = vmatpush.bf16.msra.mxu0 %v2391_v53  ;;  %2579 = vmatpush.bf16.msra.mxu1 %v2391_v53 }
 0x1f5   : > { %2580 = vmatpush.bf16.msra.mxu2 %v2391_v53  ;;  %2581 = vmatpush.bf16.msra.mxu3 %v2391_v53 }
 0x1f6   : > { %v1115_v56 = vmul.f32 %v2705_v48, %v1114_v54  ;;  %v1142_v54 = vld [vmem:[#allocation3 + $0x30] sm:$0xff] }
 0x1f8   : > { %v1119_v58 = vsel %vm1118_vm3, %v2705_v48, %v1115_v56 }
 0x1f9   : > { %v1120_v59 = vmul.f32 %v1119_v58, %v1108_v55 }
 0x1fb   : > { %1121 = vst [vmem:[#allocation4 + $0x4] sm:$0x1] %v1120_v59  ;;  %v1123_v61 = vmul.f32 %v1120_v59, %v1102_v37 }
 0x1fd   : > { %v1124_v62 = vsub.f32 %v1122_v60, %v1123_v61 }
 0x1ff   : > { %1125 = vst [vmem:[#allocation4 + $0x5] sm:$0x1] %v1124_v62 }
 0x202   : > { %v3103_v0 = vld [vmem:[#allocation4 + $0x4] ss:$0 sm:$0xff] }
 0x203   : > { %v1145_v11 = vmul.f32 %v3103_v0, %v1127_v63  ;;  %v1146_v12 = vmul.f32 %v3103_v0, %v1128_v57  ;;  %v1149_v14 = vmul.f32 %v3103_v0, %v1131_v1  ;;  %v1150_v15 = vmul.f32 %v3103_v0, %v1132_v2 }
 0x204   : > { %v1153_v19 = vmul.f32 %v3103_v0, %v1135_v3  ;;  %v1154_v20 = vmul.f32 %v3103_v0, %v1136_v4  ;;  %v1157_v21 = vmul.f32 %v3103_v0, %v1139_v6  ;;  %v1158_v22 = vmul.f32 %v3103_v0, %v1140_v7 }
 0x205   : > { %v1147_v5 = vmul.f32 %v3103_v0, %v1129_v9  ;;  %v1148_v25 = vmul.f32 %v3103_v0, %v1130_v8  ;;  %v1151_v26 = vmul.f32 %v3103_v0, %v1133_v10  ;;  %v1152_v27 = vmul.f32 %v3103_v0, %v1134_v16 }
 0x206   : > { %v3113_v23 = vld [vmem:[#allocation4 + $0x5] ss:$0 sm:$0xff]  ;;  %v1155_v28 = vmul.f32 %v3103_v0, %v1137_v17  ;;  %v1156_v13 = vmul.f32 %v3103_v0, %v1138_v18  ;;  %v1159_v63 = vmul.f32 %v3103_v0, %v1141_v49  ;;  %v1160_v1 = vmul.f32 %v3103_v0, %v1142_v54 }
 0x207   : > { %v1163_v29 = vadd.f32 %v3113_v23, %v1145_v11  ;;  %v1164_v30 = vadd.f32 %v3113_v23, %v1146_v12  ;;  %v1167_v31 = vadd.f32 %v3113_v23, %v1149_v14  ;;  %v1168_v32 = vadd.f32 %v3113_v23, %v1150_v15 }
 0x208   : > { %v1171_v33 = vadd.f32 %v3113_v23, %v1153_v19  ;;  %v1172_v34 = vadd.f32 %v3113_v23, %v1154_v20  ;;  %v1175_v35 = vadd.f32 %v3113_v23, %v1157_v21  ;;  %v1176_v36 = vadd.f32 %v3113_v23, %v1158_v22 }
 0x209   : > { %vm1179_vm4 = vcmp.gt.f32.partialorder %v1163_v29, 0.0  ;;  %vm1180_vm5 = vcmp.gt.f32.partialorder %v1164_v30, 0.0  ;;  %v1197_v37 = vmul.f32 %v3115_v24, %v1163_v29  ;;  %v1198_v38 = vmul.f32 %v3115_v24, %v1164_v30 }
 0x20a   : > { %vm1183_vm6 = vcmp.gt.f32.partialorder %v1167_v31, 0.0  ;;  %vm1184_vm7 = vcmp.gt.f32.partialorder %v1168_v32, 0.0  ;;  %v1201_v39 = vmul.f32 %v3115_v24, %v1167_v31  ;;  %v1202_v40 = vmul.f32 %v3115_v24, %v1168_v32 }
 0x20b   : > { %v1213_v41 = vsel %vm1179_vm4, %v1163_v29, %v1197_v37  ;;  %v1214_v42 = vsel %vm1180_vm5, %v1164_v30, %v1198_v38  ;;  %vm1187_vm8 = vcmp.gt.f32.partialorder %v1171_v33, 0.0  ;;  %vm1188_vm9 = vcmp.gt.f32.partialorder %v1172_v34, 0.0 }
 0x20c   : > { %v1229_v43 = vpack.c.bf16 %v1214_v42, %v1213_v41  ;;  %v1217_v44 = vsel %vm1183_vm6, %v1167_v31, %v1201_v39  ;;  %v1218_v45 = vsel %vm1184_vm7, %v1168_v32, %v1202_v40  ;;  %v1205_v46 = vmul.f32 %v3115_v24, %v1171_v33 }
 0x20d   : > { %v1231_v47 = vpack.c.bf16 %v1218_v45, %v1217_v44  ;;  %v1206_v48 = vmul.f32 %v3115_v24, %v1172_v34  ;;  %vm1191_vm10 = vcmp.gt.f32.partialorder %v1175_v35, 0.0  ;;  %vm1192_vm11 = vcmp.gt.f32.partialorder %v1176_v36, 0.0 }
 0x20e   : > { %1309 = vmatmul.bf16.vlgmr.msra.gmra.mxu0 %v1229_v43  ;;  %v1221_v50 = vsel %vm1187_vm8, %v1171_v33, %v1205_v46  ;;  %v1209_v51 = vmul.f32 %v3115_v24, %v1175_v35  ;;  %v1210_v52 = vmul.f32 %v3115_v24, %v1176_v36  ;;  %v1165_v53 = vadd.f32 %v3113_v23, %v1147_v5 }
 0x20f   : > { %1319 = vmatmul.bf16.vlgmr.msra.gmra.mxu1 %v1231_v47  ;;  %v1222_v55 = vsel %vm1188_vm9, %v1172_v34, %v1206_v48  ;;  %v1166_v56 = vadd.f32 %v3113_v23, %v1148_v25  ;;  %v1169_v58 = vadd.f32 %v3113_v23, %v1151_v26  ;;  %v1170_v59 = vadd.f32 %v3113_v23, %v1152_v27 }
 0x210   : > { %v1233_v60 = vpack.c.bf16 %v1222_v55, %v1221_v50  ;;  %v1225_v61 = vsel %vm1191_vm10, %v1175_v35, %v1209_v51  ;;  %v1226_v62 = vsel %vm1192_vm11, %v1176_v36, %v1210_v52  ;;  %vm1181_vm12 = vcmp.gt.f32.partialorder %v1165_v53, 0.0 }
 0x211   : > { %v1235_v57 = vpack.c.bf16 %v1226_v62, %v1225_v61  ;;  %vm1182_vm13 = vcmp.gt.f32.partialorder %v1166_v56, 0.0  ;;  %v1199_v2 = vmul.f32 %v3115_v24, %v1165_v53  ;;  %v1200_v3 = vmul.f32 %v3115_v24, %v1166_v56 }
 0x212   : > { %1329 = vmatmul.bf16.vlgmr.msra.gmra.mxu2 %v1233_v60  ;;  %v1203_v4 = vmul.f32 %v3115_v24, %v1169_v58  ;;  %v1204_v6 = vmul.f32 %v3115_v24, %v1170_v59  ;;  %v1173_v7 = vadd.f32 %v3113_v23, %v1155_v28  ;;  %v1174_v9 = vadd.f32 %v3113_v23, %v1156_v13 }
 0x213   : > { %1339 = vmatmul.bf16.vlgmr.msra.gmra.mxu3 %v1235_v57  ;;  %vm1185_vm14 = vcmp.gt.f32.partialorder %v1169_v58, 0.0  ;;  %vm1186_vm15 = vcmp.gt.f32.partialorder %v1170_v59, 0.0  ;;  %v1177_v0 = vadd.f32 %v3113_v23, %v1159_v63  ;;  %v1215_v8 = vsel %vm1181_vm12, %v1165_v53, %v1199_v2 }
 0x214   : > { %v1216_v10 = vsel %vm1182_vm13, %v1166_v56, %v1200_v3  ;;  %v1178_v11 = vadd.f32 %v3113_v23, %v1160_v1  ;;  %v1219_v12 = vsel %vm1185_vm14, %v1169_v58, %v1203_v4  ;;  %v1220_v14 = vsel %vm1186_vm15, %v1170_v59, %v1204_v6 }
 0x215   : > { %v1207_v15 = vmul.f32 %v3115_v24, %v1173_v7  ;;  %v1208_v16 = vmul.f32 %v3115_v24, %v1174_v9  ;;  %vm1189_vm0 = vcmp.gt.f32.partialorder %v1173_v7, 0.0  ;;  %vm1190_vm1 = vcmp.gt.f32.partialorder %v1174_v9, 0.0 }
 0x216   : > { %v1211_v17 = vmul.f32 %v3115_v24, %v1177_v0  ;;  %v1212_v18 = vmul.f32 %v3115_v24, %v1178_v11  ;;  %vm1193_vm2 = vcmp.gt.f32.partialorder %v1177_v0, 0.0  ;;  %vm1194_vm3 = vcmp.gt.f32.partialorder %v1178_v11, 0.0 }
 0x217   : > { %v1230_v19 = vpack.c.bf16 %v1216_v10, %v1215_v8  ;;  %v1232_v20 = vpack.c.bf16 %v1220_v14, %v1219_v12  ;;  %v1223_v21 = vsel %vm1189_vm0, %v1173_v7, %v1207_v15  ;;  %v1224_v22 = vsel %vm1190_vm1, %v1174_v9, %v1208_v16 }
 0x218   : > { %v1227_v5 = vsel %vm1193_vm2, %v1177_v0, %v1211_v17  ;;  %v1228_v23 = vsel %vm1194_vm3, %v1178_v11, %v1212_v18  ;;  %v1234_v25 = vpack.c.bf16 %v1224_v22, %v1223_v21 }
 0x219   : > { %v1236_v26 = vpack.c.bf16 %v1228_v23, %v1227_v5 }
 0x21e   : > { %1314 = vmatmul.bf16.gmra.mxu0 %v1230_v19 }
 0x21f   : > { %1324 = vmatmul.bf16.gmra.mxu1 %v1232_v20 }
 0x222   : > { %1334 = vmatmul.bf16.gmra.mxu2 %v1234_v25 }
 0x223   : > { %1344 = vmatmul.bf16.gmra.mxu3 %v1236_v26 }
 0x28b   : > { %v1310_v27 = vpop.f32.mrf.mxu0 }
 0x28c   : > { %v1320_v28 = vpop.f32.mrf.mxu1 }
 0x293   : > { %v1312_v13 = vpop.f32.mrf.mxu0 }
 0x294   : > { %v2459_v29 = vpack.c.bf16 %v1312_v13, %v1310_v27  ;;  %v1322_v30 = vpop.f32.mrf.mxu1 }
 0x295   : > { %v1330_v24 = vpop.f32.mrf.mxu2  ;;  %v2469_v31 = vpack.c.bf16 %v1322_v30, %v1320_v28 }
 0x296   : > { %v1340_v32 = vpop.f32.mrf.mxu3  ;;  %2460 = vst [vmem:[#allocation2 + $0x30] sm:$0xff] %v2459_v29  }
 0x297   : > { %2504 = vst [vmem:[#allocation2 + $0x18] sm:$0xff] %v2469_v31  }
 0x29b   : > { %v1315_v33 = vpop.f32.mrf.mxu0 }
 0x29c   : > { %v1325_v34 = vpop.f32.mrf.mxu1 }
 0x29d   : > { %v1332_v35 = vpop.f32.mrf.mxu2 }
 0x29e   : > { %v2479_v36 = vpack.c.bf16 %v1332_v35, %v1330_v24  ;;  %v1342_v37 = vpop.f32.mrf.mxu3 }
 0x29f   : > { %v2489_v38 = vpack.c.bf16 %v1342_v37, %v1340_v32 }
 0x2a0   : > { %2506 = vst [vmem:[#allocation2 + $0x8] sm:$0xff] %v2479_v36  }
 0x2a1   : > { %2508 = vst [vmem:[#allocation2 + $0x28] sm:$0xff] %v2489_v38  }
 0x2a3   : > { %v1317_v39 = vpop.f32.mrf.mxu0 }
 0x2a4   : > { %v2464_v40 = vpack.c.bf16 %v1317_v39, %v1315_v33  ;;  %v1327_v41 = vpop.f32.mrf.mxu1 }
 0x2a5   : > { %v1335_v42 = vpop.f32.mrf.mxu2  ;;  %v2474_v43 = vpack.c.bf16 %v1327_v41, %v1325_v34 }
 0x2a6   : > { %v1345_v44 = vpop.f32.mrf.mxu3  ;;  %2503 = vst [vmem:[#allocation2] sm:$0xff] %v2464_v40  }
 0x2a7   : > { %2505 = vst [vmem:[#allocation2 + $0x10] sm:$0xff] %v2474_v43  }
 0x2ad   : > { %v1337_v45 = vpop.f32.mrf.mxu2 }
 0x2ae   : > { %v2484_v46 = vpack.c.bf16 %v1337_v45, %v1335_v42  ;;  %v1347_v47 = vpop.f32.mrf.mxu3 }
 0x2af   : > { %v2494_v48 = vpack.c.bf16 %v1347_v47, %v1345_v44 }
 0x2b0   : > { %2507 = vst [vmem:[#allocation2 + $0x20] sm:$0xff] %v2484_v46  }
 0x2b1   : > { %2509 = vst [vmem:[#allocation2 + $0x38] sm:$0xff] %v2494_v48  }
 0x2b2 PF: > { %p2287_p13 = scmp.ne.s32.totalorder %s2924_s18, 3 }
 0x2b4   : > { %1389 = sbr.rel (%p2287_p13) target bundleno = 925 (0x39d), region = 96 }
 0x2b9   : > { %v2414_v49 = vld [vmem:[#allocation2 + $0x38] sm:$0xff]  ;;  %v2413_v50 = vld [vmem:[#allocation2 + $0x28] sm:$0xff]  ;;  %v2412_v51 = vld [vmem:[#allocation2 + $0x20] sm:$0xff]  ;;  %vm1772_vm4 = vcmask 1040384  }
 0x2ba   : > { %1522 = vmatpush.bf16.msra.mxu0 %v2414_v49  ;;  %2582 = vmatpush.bf16.msra.mxu1 %v2414_v49  ;;  %v2411_v52 = vld [vmem:[#allocation2 + $0x8] sm:$0xff]  ;;  %v2410_v53 = vld [vmem:[#allocation2 + $0x10] sm:$0xff]  ;;  %v2409_v54 = vld [vmem:[#allocation2 + $0x18] sm:$0xff] }
 0x2bb   : > { %2583 = vmatpush.bf16.msra.mxu2 %v2414_v49  ;;  %2584 = vmatpush.bf16.msra.mxu3 %v2414_v49  ;;  %v2408_v55 = vld [vmem:[#allocation2] sm:$0xff]  ;;  %v2407_v56 = vld [vmem:[#allocation2 + $0x30] sm:$0xff]  ;;  %v2399_v58 = vld [vmem:[#allocation5] sm:$0xff] }
 0x2bc   : > { %v2401_v59 = vld [vmem:[#allocation5 + $0x10] sm:$0xff]  ;;  %v2403_v60 = vld [vmem:[#allocation5 + $0x20] sm:$0xff]  ;;  %v2400_v62 = vld [vmem:[#allocation5 + $0x8] sm:$0xff] }
 0x2bd   : > { %v2405_v61 = vld [vmem:[#allocation5 + $0x30] sm:$0xff]  ;;  %v2402_v63 = vld [vmem:[#allocation5 + $0x18] sm:$0xff]  ;;  %v2404_v57 = vld [vmem:[#allocation5 + $0x28] sm:$0xff] }
 0x2be   : > { %1523 = vmatpush.bf16.msra.mxu0 %v2413_v50  ;;  %2585 = vmatpush.bf16.msra.mxu1 %v2413_v50  ;;  %v2406_v1 = vld [vmem:[#allocation5 + $0x38] sm:$0xff]  ;;  %v3159_v2 = vld [vmem:[#allocation13 + $0x3] ss:$0 sm:$0xff] }
 0x2bf   : > { %2586 = vmatpush.bf16.msra.mxu2 %v2413_v50  ;;  %2587 = vmatpush.bf16.msra.mxu3 %v2413_v50 }
 0x2c2   : > { %1524 = vmatpush.bf16.msra.mxu0 %v2412_v51  ;;  %2588 = vmatpush.bf16.msra.mxu1 %v2412_v51 }
 0x2c3   : > { %2589 = vmatpush.bf16.msra.mxu2 %v2412_v51  ;;  %2590 = vmatpush.bf16.msra.mxu3 %v2412_v51 }
 0x2c6   : > { %1525 = vmatpush.bf16.msra.mxu0 %v2411_v52  ;;  %2591 = vmatpush.bf16.msra.mxu1 %v2411_v52 }
 0x2c7   : > { %2592 = vmatpush.bf16.msra.mxu2 %v2411_v52  ;;  %2593 = vmatpush.bf16.msra.mxu3 %v2411_v52 }
 0x2ca   : > { %1526 = vmatpush.bf16.msra.mxu0 %v2410_v53  ;;  %2594 = vmatpush.bf16.msra.mxu1 %v2410_v53 }
 0x2cb   : > { %2595 = vmatpush.bf16.msra.mxu2 %v2410_v53  ;;  %2596 = vmatpush.bf16.msra.mxu3 %v2410_v53 }
 0x2ce   : > { %1527 = vmatpush.bf16.msra.mxu0 %v2409_v54  ;;  %2597 = vmatpush.bf16.msra.mxu1 %v2409_v54 }
 0x2cf   : > { %2598 = vmatpush.bf16.msra.mxu2 %v2409_v54  ;;  %2599 = vmatpush.bf16.msra.mxu3 %v2409_v54 }
 0x2d2   : > { %1528 = vmatpush.bf16.msra.mxu0 %v2408_v55  ;;  %2600 = vmatpush.bf16.msra.mxu1 %v2408_v55 }
 0x2d3   : > { %2601 = vmatpush.bf16.msra.mxu2 %v2408_v55  ;;  %2602 = vmatpush.bf16.msra.mxu3 %v2408_v55 }
 0x2d6   : > { %1529 = vmatpush.bf16.msra.mxu0 %v2407_v56  ;;  %2603 = vmatpush.bf16.msra.mxu1 %v2407_v56 }
 0x2d7   : > { %2604 = vmatpush.bf16.msra.mxu2 %v2407_v56  ;;  %2605 = vmatpush.bf16.msra.mxu3 %v2407_v56 }
 0x2d9   : > { %1530 = vmatmul.bf16.vlgmr.msra.gmra.mxu0 %v2399_v58  ;;  %1540 = vmatmul.bf16.vlgmr.msra.gmra.mxu1 %v2401_v59 }
 0x2da   : > { %1550 = vmatmul.bf16.vlgmr.msra.gmra.mxu2 %v2403_v60  ;;  %1560 = vmatmul.bf16.vlgmr.msra.gmra.mxu3 %v2405_v61 }
 0x2e9   : > { %1535 = vmatmul.bf16.gmra.mxu0 %v2400_v62  ;;  %1545 = vmatmul.bf16.gmra.mxu1 %v2402_v63 }
 0x2ea   : > { %1555 = vmatmul.bf16.gmra.mxu2 %v2404_v57  ;;  %1565 = vmatmul.bf16.gmra.mxu3 %v2406_v1 }
 0x356   : > { %v1531_v3 = vpop.f32.mrf.mxu0  ;;  %v1541_v4 = vpop.f32.mrf.mxu1 }
 0x357   : > { %v1666_v6 = vadd.f32 %v3159_v2, %v1531_v3  ;;  %v1670_v7 = vadd.f32 %v3159_v2, %v1541_v4 }
 0x359   : > { %1682 = vst [vmem:[#allocation3] sm:$0xff] %v1666_v6  ;;  %v1735_v25 = vmul.f32 %v1666_v6, %v1666_v6  ;;  %v1739_v40 = vmul.f32 %v1670_v7, %v1670_v7 }
 0x35a   : > { %1686 = vst [vmem:[#allocation3 + $0x68] sm:$0xff] %v1670_v7 }
 0x35d   : > { %v1551_v9 = vpop.f32.mrf.mxu2  ;;  %v1561_v0 = vpop.f32.mrf.mxu3 }
 0x35e   : > { %v3164_v8 = vadd.f32 %v3159_v2, %v1551_v9  ;;  %v1533_v10 = vpop.f32.mrf.mxu0  ;;  %v1543_v11 = vpop.f32.mrf.mxu1  ;;  %v3170_v15 = vadd.f32 %v3159_v2, %v1561_v0 }
 0x35f   : > { %v1667_v12 = vadd.f32 %v3159_v2, %v1533_v10  ;;  %v1671_v14 = vadd.f32 %v3159_v2, %v1543_v11 }
 0x360   : > { %1690 = vst [vmem:[#allocation3 + $0x28] sm:$0xff] %v3164_v8  ;;  %v1706_v50 = vmul.f32 0.0, %v3164_v8 }
 0x361   : > { %1683 = vst [vmem:[#allocation3 + $0x18] sm:$0xff] %v1667_v12  ;;  %v1736_v23 = vmul.f32 %v1667_v12, %v1667_v12  ;;  %v1714_v26 = vadd.f32 %v1667_v12, %v1666_v6  ;;  %v1703_v35 = vmul.f32 0.0, %v1671_v14 }
 0x362   : > { %1687 = vst [vmem:[#allocation3 + $0x20] sm:$0xff] %v1671_v14  ;;  %v1743_v61 = vmul.f32 %v1706_v50, %v3164_v8 }
 0x363   : > { %1694 = vst [vmem:[#allocation3 + $0x58] sm:$0xff] %v3170_v15  ;;  %v1751_v31 = vadd.f32 %v1736_v23, %v1735_v25  ;;  %v1740_v44 = vmul.f32 %v1703_v35, %v1671_v14 }
 0x365   : > { %v1553_v16 = vpop.f32.mrf.mxu2  ;;  %v1563_v17 = vpop.f32.mrf.mxu3 }
 0x366   : > { %v1675_v18 = vadd.f32 %v3159_v2, %v1553_v16  ;;  %v1536_v19 = vpop.f32.mrf.mxu0  ;;  %v1546_v20 = vpop.f32.mrf.mxu1  ;;  %v3177_v5 = vadd.f32 %v3159_v2, %v1563_v17 }
 0x367   : > { %v1668_v21 = vadd.f32 %v3159_v2, %v1536_v19  ;;  %v1672_v22 = vadd.f32 %v3159_v2, %v1546_v20 }
 0x368   : > { %1691 = vst [vmem:[#allocation3 + $0x40] sm:$0xff] %v1675_v18  ;;  %v1707_v56 = vmul.f32 0.0, %v1675_v18  ;;  %v1711_v10 = vmul.f32 0.0, %v3177_v5 }
 0x369   : > { %1684 = vst [vmem:[#allocation3 + $0x50] sm:$0xff] %v1668_v21  ;;  %v1737_v27 = vmul.f32 %v1668_v21, %v1668_v21  ;;  %v1715_v32 = vadd.f32 %v1714_v26, %v1668_v21  ;;  %v1704_v41 = vmul.f32 0.0, %v1672_v22 }
 0x36a   : > { %1688 = vst [vmem:[#allocation3 + $0x70] sm:$0xff] %v1672_v22  ;;  %v1744_v1 = vmul.f32 %v1707_v56, %v1675_v18  ;;  %v1748_v18 = vmul.f32 %v1711_v10, %v3177_v5 }
 0x36b   : > { %1695 = vst [vmem:[#allocation3 + $0x48] sm:$0xff] %v3177_v5  ;;  %v1752_v36 = vadd.f32 %v1751_v31, %v1737_v27  ;;  %v1741_v52 = vmul.f32 %v1704_v41, %v1672_v22 }
 0x36d   : > { %v1556_v28 = vpop.f32.mrf.mxu2  ;;  %v1566_v13 = vpop.f32.mrf.mxu3 }
 0x36e   : > { %v1676_v29 = vadd.f32 %v3159_v2, %v1556_v28  ;;  %v1538_v30 = vpop.f32.mrf.mxu0  ;;  %v1548_v24 = vpop.f32.mrf.mxu1  ;;  %v1680_v39 = vadd.f32 %v3159_v2, %v1566_v13 }
 0x36f   : > { %v1669_v33 = vadd.f32 %v3159_v2, %v1538_v30  ;;  %v1673_v34 = vadd.f32 %v3159_v2, %v1548_v24 }
 0x370   : > { %1692 = vst [vmem:[#allocation3 + $0x38] sm:$0xff] %v1676_v29  ;;  %v1708_v62 = vmul.f32 0.0, %v1676_v29  ;;  %v1712_v8 = vmul.f32 0.0, %v1680_v39 }
 0x371   : > { %1685 = vst [vmem:[#allocation3 + $0x60] sm:$0xff] %v1669_v33  ;;  %v1716_v37 = vadd.f32 %v1715_v32, %v1669_v33  ;;  %v1738_v38 = vmul.f32 %v1669_v33, %v1669_v33  ;;  %v1705_v47 = vmul.f32 0.0, %v1673_v34 }
 0x372   : > { %1689 = vst [vmem:[#allocation3 + $0x10] sm:$0xff] %v1673_v34  ;;  %v1745_v9 = vmul.f32 %v1708_v62, %v1676_v29  ;;  %v1749_v23 = vmul.f32 %v1712_v8, %v1680_v39 }
 0x373   : > { %v1717_v42 = vadd.f32 %v1716_v37, %v1670_v7  ;;  %v1753_v43 = vadd.f32 %v1752_v36, %v1738_v38  ;;  %1696 = vst [vmem:[#allocation3 + $0x78] sm:$0xff] %v1680_v39  ;;  %v1742_v59 = vmul.f32 %v1705_v47, %v1673_v34  ;;  %v1710_v7 = vmul.f32 0.0, %v3170_v15  ;;  %v1774_v39 = vld [vmem:[#allocation4 + $0x2] sm:$0x3] }
 0x375   : > { %v1718_v45 = vadd.f32 %v1717_v42, %v1703_v35  ;;  %v1754_v46 = vadd.f32 %v1753_v43, %v1739_v40  ;;  %v1558_v48 = vpop.f32.mrf.mxu2  ;;  %v1568_v49 = vpop.f32.mrf.mxu3  ;;  %v1747_v16 = vmul.f32 %v1710_v7, %v3170_v15 }
 0x376   : > { %v1677_v51 = vadd.f32 %v3159_v2, %v1558_v48  ;;  %v1681_v55 = vadd.f32 %v3159_v2, %v1568_v49 }
 0x377   : > { %v1719_v53 = vadd.f32 %v1718_v45, %v1704_v41  ;;  %v1755_v54 = vadd.f32 %v1754_v46, %v1740_v44 }
 0x378   : > { %1693 = vst [vmem:[#allocation3 + $0x8] sm:$0xff] %v1677_v51  ;;  %v1709_v4 = vmul.f32 0.0, %v1677_v51  ;;  %v1713_v21 = vmul.f32 0.0, %v1681_v55 }
 0x379   : > { %v1720_v58 = vadd.f32 %v1719_v53, %v1705_v47  ;;  %v1756_v60 = vadd.f32 %v1755_v54, %v1741_v52  ;;  %1697 = vst [vmem:[#allocation3 + $0x30] sm:$0xff] %v1681_v55 }
 0x37a   : > { %v1746_v12 = vmul.f32 %v1709_v4, %v1677_v51  ;;  %v1750_v28 = vmul.f32 %v1713_v21, %v1681_v55 }
 0x37b   : > { %v1721_v63 = vadd.f32 %v1720_v58, %v1706_v50  ;;  %v1757_v57 = vadd.f32 %v1756_v60, %v1742_v59 }
 0x37d   : > { %v1758_v3 = vadd.f32 %v1757_v57, %v1743_v61  ;;  %v1722_v6 = vadd.f32 %v1721_v63, %v1707_v56 }
 0x37f   : > { %v1723_v0 = vadd.f32 %v1722_v6, %v1708_v62  ;;  %v1759_v2 = vadd.f32 %v1758_v3, %v1744_v1 }
 0x381   : > { %v1724_v11 = vadd.f32 %v1723_v0, %v1709_v4  ;;  %v1760_v14 = vadd.f32 %v1759_v2, %v1745_v9 }
 0x383   : > { %v1725_v17 = vadd.f32 %v1724_v11, %v1710_v7  ;;  %v1761_v19 = vadd.f32 %v1760_v14, %v1746_v12 }
 0x385   : > { %v1762_v20 = vadd.f32 %v1761_v19, %v1747_v16  ;;  %v1726_v22 = vadd.f32 %v1725_v17, %v1711_v10 }
 0x387   : > { %v1727_v25 = vadd.f32 %v1726_v22, %v1712_v8  ;;  %v1763_v26 = vadd.f32 %v1762_v20, %v1748_v18 }
 0x389   : > { %v1728_v27 = vadd.f32 %v1727_v25, %v1713_v21  ;;  %v1764_v13 = vadd.f32 %v1763_v26, %v1749_v23 }
 0x38b   : > { %v1729_v29 = vrot.slane %v1728_v27, 4  ;;  %v1765_v30 = vadd.f32 %v1764_v13, %v1750_v28 }
 0x38d   : > { %v1730_v24 = vadd.f32 %v1729_v29, %v1728_v27  ;;  %v1766_v31 = vrot.slane %v1765_v30, 4 }
 0x38f   : > { %v1731_v32 = vrot.slane %v1730_v24, 2  ;;  %v1767_v15 = vadd.f32 %v1766_v31, %v1765_v30 }
 0x391   : > { %v1732_v33 = vadd.f32 %v1731_v32, %v1730_v24  ;;  %v1768_v34 = vrot.slane %v1767_v15, 2 }
 0x393   : > { %v1733_v35 = vrot.slane %v1732_v33, 1  ;;  %v1769_v36 = vadd.f32 %v1768_v34, %v1767_v15 }
 0x395   : > { %v1770_v5 = vrot.slane %v1769_v36, 1  ;;  %v1734_v37 = vadd.f32 %v1733_v35, %v1732_v33 }
 0x397   : > { %v1771_v38 = vadd.f32 %v1770_v5, %v1769_v36 }
 0x399   : > { %v1773_v40 = vsel %vm1772_vm4, %v1734_v37, %v1771_v38 }
 0x39a   : > { %v1775_v41 = vadd.f32 %v1774_v39, %v1773_v40 }
 0x39c   : > { %1776 = vst [vmem:[#allocation4 + $0x2] sm:$0x3] %v1775_v41 }
 0x39d PF: > { %p1777_p0 = scmp.eq.s32.totalorder %s2924_s18, 4 }
 0x39e   : > { %v1793_v55 = vld [vmem:[#allocation13 + $0x4] sm:$0x1] (%p1777_p0)  ;;  %v1807_v60 = vld [vmem:[#allocation13 + $0x5] sm:$0x1] (%p1777_p0)  ;;  %v1812_v63 = vld [vmem:[#allocation3] sm:$0xff] (%p1777_p0) }
 0x39f   : > { %1781 = sbr.rel (!%p1777_p0) target bundleno = 995 (0x3e3), region = 112  ;;  %v1813_v57 = vld [vmem:[#allocation3 + $0x18] sm:$0xff] (%p1777_p0)  ;;  %v1814_v1 = vld [vmem:[#allocation3 + $0x50] sm:$0xff] (%p1777_p0)  ;;  %v1815_v3 = vld [vmem:[#allocation3 + $0x60] sm:$0xff] (%p1777_p0) }
 0x3a0   : > { %v1816_v4 = vld [vmem:[#allocation3 + $0x68] sm:$0xff] (%p1777_p0)  ;;  %v1817_v6 = vld [vmem:[#allocation3 + $0x20] sm:$0xff] (%p1777_p0)  ;;  %v1818_v7 = vld [vmem:[#allocation3 + $0x70] sm:$0xff] (%p1777_p0) }
 0x3a1   : > { %v1819_v9 = vld [vmem:[#allocation3 + $0x10] sm:$0xff] (%p1777_p0)  ;;  %v1820_v0 = vld [vmem:[#allocation3 + $0x28] sm:$0xff] (%p1777_p0)  ;;  %v1821_v10 = vld [vmem:[#allocation3 + $0x40] sm:$0xff] (%p1777_p0) }
 0x3a2   : > { %v1822_v11 = vld [vmem:[#allocation3 + $0x38] sm:$0xff] (%p1777_p0)  ;;  %v1823_v12 = vld [vmem:[#allocation3 + $0x8] sm:$0xff] (%p1777_p0)  ;;  %v1827_v21 = vld [vmem:[#allocation3 + $0x30] sm:$0xff] (%p1777_p0) }
 0x3a3   : > { %v1786_v42 = vld [vmem:[#allocation4 + $0x2] sm:$0x1] (%p1777_p0)  ;;  %v1788_v43 = vld [vmem:[#allocation4 + $0x3] sm:$0x1] (%p1777_p0)  ;;  %v1824_v14 = vld [vmem:[#allocation3 + $0x58] sm:$0xff] (%p1777_p0) }
 0x3a4   : > { %v1787_v44 = vmul.f32 0.025, %v1786_v42  ;;  %v1789_v45 = vmul.f32 0.025, %v1788_v43  ;;  %v1825_v18 = vld [vmem:[#allocation3 + $0x48] sm:$0xff]  ;;  %v1826_v20 = vld [vmem:[#allocation3 + $0x78] sm:$0xff] }
 0x3a5   : > { %v3195_v28 = vld [vmem:[#allocation13 + $0x7] ss:$0 sm:$0xff] }
 0x3a6   : > { %v1790_v46 = vmul.f32 %v1787_v44, %v1787_v44 }
 0x3a8   : > { %v1791_v47 = vsub.f32 %v1789_v45, %v1790_v46 }
 0x3aa   : > { %v1792_v48 = vmax.f32 %v1791_v47, 0.0 }
 0x3ac   : > { %v1794_v49 = vadd.f32 1e-05, %v1792_v48 }
 0x3ae   : > { %2710 = vrsqrt.f32 %v1794_v49  ;;  %vm1801_vm5 = vweird.f32 %v1794_v49 }
 0x3b4   : > { %v2711_v50 = vpop.eup %2710 }
 0x3b5   : > { %v1796_v51 = vmul.f32 %v2711_v50, %v1794_v49  ;;  %vm1802_vm6 = vweird.f32 %v2711_v50 }
 0x3b6   : > { %vm1803_vm7 = vmor %vm1801_vm5, %vm1802_vm6 }
 0x3b7   : > { %v1797_v52 = vmul.f32 %v2711_v50, %v1796_v51 }
 0x3b9   : > { %v1798_v53 = vmul.f32 0.5, %v1797_v52 }
 0x3bb   : > { %v1799_v54 = vsub.f32 1.5, %v1798_v53 }
 0x3bd   : > { %v1800_v56 = vmul.f32 %v2711_v50, %v1799_v54 }
 0x3bf   : > { %v1804_v58 = vsel %vm1803_vm7, %v2711_v50, %v1800_v56 }
 0x3c0   : > { %v1805_v59 = vmul.f32 %v1804_v58, %v1793_v55 }
 0x3c2   : > { %1806 = vst [vmem:[#allocation4 + $0x6] sm:$0x1] %v1805_v59  ;;  %v1808_v61 = vmul.f32 %v1805_v59, %v1787_v44 }
 0x3c4   : > { %v1809_v62 = vsub.f32 %v1807_v60, %v1808_v61 }
 0x3c6   : > { %1810 = vst [vmem:[#allocation4 + $0x7] sm:$0x1] %v1809_v62 }
 0x3c9   : > { %v2707_v2 = vld [vmem:[#allocation4 + $0x6] ss:$0 sm:$0xff] }
 0x3ca   : > { %v1830_v16 = vmul.f32 %v2707_v2, %v1812_v63  ;;  %v1831_v8 = vmul.f32 %v2707_v2, %v1813_v57  ;;  %v1832_v17 = vmul.f32 %v2707_v2, %v1814_v1  ;;  %v1833_v19 = vmul.f32 %v2707_v2, %v1815_v3 }
 0x3cb   : > { %v1834_v22 = vmul.f32 %v2707_v2, %v1816_v4  ;;  %v1835_v23 = vmul.f32 %v2707_v2, %v1817_v6  ;;  %v1836_v25 = vmul.f32 %v2707_v2, %v1818_v7  ;;  %v1837_v26 = vmul.f32 %v2707_v2, %v1819_v9 }
 0x3cc   : > { %v1838_v13 = vmul.f32 %v2707_v2, %v1820_v0  ;;  %v1839_v29 = vmul.f32 %v2707_v2, %v1821_v10  ;;  %v1840_v30 = vmul.f32 %v2707_v2, %v1822_v11  ;;  %v1841_v24 = vmul.f32 %v2707_v2, %v1823_v12 }
 0x3cd   : > { %v3193_v27 = vld [vmem:[#allocation4 + $0x7] ss:$0 sm:$0xff]  ;;  %v1842_v31 = vmul.f32 %v2707_v2, %v1824_v14  ;;  %v1843_v32 = vmul.f32 %v2707_v2, %v1825_v18  ;;  %v1844_v15 = vmul.f32 %v2707_v2, %v1826_v20  ;;  %v3197_v33 = vmul.f32 %v2707_v2, %v1827_v21 }
 0x3ce   : > { %v1848_v34 = vadd.f32 %v3193_v27, %v1830_v16  ;;  %v1849_v35 = vadd.f32 %v3193_v27, %v1831_v8  ;;  %v1850_v36 = vadd.f32 %v3193_v27, %v1832_v17  ;;  %v1851_v5 = vadd.f32 %v3193_v27, %v1833_v19 }
 0x3cf   : > { %v1852_v37 = vadd.f32 %v3193_v27, %v1834_v22  ;;  %v1853_v38 = vadd.f32 %v3193_v27, %v1835_v23  ;;  %v1854_v39 = vadd.f32 %v3193_v27, %v1836_v25  ;;  %v1855_v40 = vadd.f32 %v3193_v27, %v1837_v26 }
 0x3d0   : > { %vm1864_vm8 = vcmp.gt.f32.partialorder %v1848_v34, 0.0  ;;  %v1882_v41 = vmul.f32 %v3195_v28, %v1848_v34  ;;  %vm1865_vm9 = vcmp.gt.f32.partialorder %v1849_v35, 0.0  ;;  %v1883_v42 = vmul.f32 %v3195_v28, %v1849_v35 }
 0x3d1   : > { %vm1866_vm10 = vcmp.gt.f32.partialorder %v1850_v36, 0.0  ;;  %v1884_v43 = vmul.f32 %v3195_v28, %v1850_v36  ;;  %vm1867_vm11 = vcmp.gt.f32.partialorder %v1851_v5, 0.0  ;;  %v1885_v44 = vmul.f32 %v3195_v28, %v1851_v5 }
 0x3d2   : > { %v1898_v45 = vsel %vm1864_vm8, %v1848_v34, %v1882_v41  ;;  %v1899_v46 = vsel %vm1865_vm9, %v1849_v35, %v1883_v42  ;;  %vm1868_vm12 = vcmp.gt.f32.partialorder %v1852_v37, 0.0  ;;  %v1886_v47 = vmul.f32 %v3195_v28, %v1852_v37 }
 0x3d3   : > { %1914 = vst [vmem:[#allocation14] sm:$0xff] %v1898_v45  ;;  %v1900_v48 = vsel %vm1866_vm10, %v1850_v36, %v1884_v43  ;;  %v1901_v49 = vsel %vm1867_vm11, %v1851_v5, %v1885_v44  ;;  %vm1869_vm13 = vcmp.gt.f32.partialorder %v1853_v38, 0.0  ;;  %v1887_v50 = vmul.f32 %v3195_v28, %v1853_v38 }
 0x3d4   : > { %1915 = vst [vmem:[#allocation14 + $0x8] sm:$0xff] %v1899_v46  ;;  %v1902_v51 = vsel %vm1868_vm12, %v1852_v37, %v1886_v47  ;;  %vm1870_vm14 = vcmp.gt.f32.partialorder %v1854_v39, 0.0  ;;  %v1888_v52 = vmul.f32 %v3195_v28, %v1854_v39  ;;  %vm1871_vm15 = vcmp.gt.f32.partialorder %v1855_v40, 0.0 }
 0x3d5   : > { %1916 = vst [vmem:[#allocation14 + $0x10] sm:$0xff] %v1900_v48  ;;  %v1903_v53 = vsel %vm1869_vm13, %v1853_v38, %v1887_v50  ;;  %v1889_v54 = vmul.f32 %v3195_v28, %v1855_v40  ;;  %v1856_v55 = vadd.f32 %v3193_v27, %v1838_v13  ;;  %v1857_v56 = vadd.f32 %v3193_v27, %v1839_v29 }
 0x3d6   : > { %1917 = vst [vmem:[#allocation14 + $0x18] sm:$0xff] %v1901_v49  ;;  %v1904_v58 = vsel %vm1870_vm14, %v1854_v39, %v1888_v52  ;;  %v1858_v59 = vadd.f32 %v3193_v27, %v1840_v30  ;;  %v1859_v60 = vadd.f32 %v3193_v27, %v1841_v24  ;;  %v1860_v61 = vadd.f32 %v3193_v27, %v1842_v31 }
 0x3d7   : > { %1918 = vst [vmem:[#allocation14 + $0x20] sm:$0xff] %v1902_v51  ;;  %v1905_v62 = vsel %vm1871_vm15, %v1855_v40, %v1889_v54  ;;  %vm1872_vm0 = vcmp.gt.f32.partialorder %v1856_v55, 0.0  ;;  %v1890_v63 = vmul.f32 %v3195_v28, %v1856_v55  ;;  %vm1873_vm1 = vcmp.gt.f32.partialorder %v1857_v56, 0.0 }
 0x3d8   : > { %1919 = vst [vmem:[#allocation14 + $0x28] sm:$0xff] %v1903_v53  ;;  %v1891_v57 = vmul.f32 %v3195_v28, %v1857_v56  ;;  %vm1874_vm2 = vcmp.gt.f32.partialorder %v1858_v59, 0.0  ;;  %v1892_v1 = vmul.f32 %v3195_v28, %v1858_v59  ;;  %vm1875_vm3 = vcmp.gt.f32.partialorder %v1859_v60, 0.0 }
 0x3d9   : > { %1920 = vst [vmem:[#allocation14 + $0x30] sm:$0xff] %v1904_v58  ;;  %v1906_v3 = vsel %vm1872_vm0, %v1856_v55, %v1890_v63  ;;  %v1893_v4 = vmul.f32 %v3195_v28, %v1859_v60  ;;  %vm1876_vm4 = vcmp.gt.f32.partialorder %v1860_v61, 0.0  ;;  %v1894_v6 = vmul.f32 %v3195_v28, %v1860_v61 }
 0x3da   : > { %1921 = vst [vmem:[#allocation14 + $0x38] sm:$0xff] %v1905_v62  ;;  %v1907_v7 = vsel %vm1873_vm1, %v1857_v56, %v1891_v57  ;;  %v1908_v9 = vsel %vm1874_vm2, %v1858_v59, %v1892_v1  ;;  %v1861_v0 = vadd.f32 %v3193_v27, %v1843_v32  ;;  %v1862_v2 = vadd.f32 %v3193_v27, %v1844_v15 }
 0x3db   : > { %1922 = vst [vmem:[#allocation14 + $0x40] sm:$0xff] %v1906_v3  ;;  %v1909_v10 = vsel %vm1875_vm3, %v1859_v60, %v1893_v4  ;;  %v1910_v11 = vsel %vm1876_vm4, %v1860_v61, %v1894_v6  ;;  %v1863_v12 = vadd.f32 %v3193_v27, %v3197_v33 }
 0x3dc   : > { %1923 = vst [vmem:[#allocation14 + $0x48] sm:$0xff] %v1907_v7  ;;  %vm1877_vm5 = vcmp.gt.f32.partialorder %v1861_v0, 0.0  ;;  %v1895_v14 = vmul.f32 %v3195_v28, %v1861_v0  ;;  %vm1878_vm6 = vcmp.gt.f32.partialorder %v1862_v2, 0.0  ;;  %v1896_v16 = vmul.f32 %v3195_v28, %v1862_v2 }
 0x3dd   : > { %1924 = vst [vmem:[#allocation14 + $0x50] sm:$0xff] %v1908_v9  ;;  %vm1879_vm7 = vcmp.gt.f32.partialorder %v1863_v12, 0.0  ;;  %v1897_v8 = vmul.f32 %v3195_v28, %v1863_v12 }
 0x3de   : > { %1925 = vst [vmem:[#allocation14 + $0x58] sm:$0xff] %v1909_v10  ;;  %v1911_v17 = vsel %vm1877_vm5, %v1861_v0, %v1895_v14  ;;  %v1912_v19 = vsel %vm1878_vm6, %v1862_v2, %v1896_v16 }
 0x3df   : > { %1926 = vst [vmem:[#allocation14 + $0x60] sm:$0xff] %v1910_v11  ;;  %v1913_v18 = vsel %vm1879_vm7, %v1863_v12, %v1897_v8 }
 0x3e0   : > { %1927 = vst [vmem:[#allocation14 + $0x68] sm:$0xff] %v1911_v17 }
 0x3e1   : > { %1928 = vst [vmem:[#allocation14 + $0x70] sm:$0xff] %v1912_v19 }
 0x3e2   : > { %1929 = vst [vmem:[#allocation14 + $0x78] sm:$0xff] %v1913_v18 }
 0x3e3 PF: > { %p2662_p1 = scmp.eq.s32.totalorder %s2991_s21, 4  ;;  %s1947_s9 = sshll.u32 %s3253_s5, 4  ;;  %s1948_s9 = int_to_ptr.hbm [resolvable:$true] %s1947_s9 }
 0x3e4   : > { %s2942_s10 = smov [#allocation14]   ;;  %s2943_s17 = smov 128  }
 0x3e5   : > { %s1945_s16 = sshll.u32 %s2942_s10, 4  ;;  %s2944_s25 = smov 8   ;;  %s1946_s16 = int_to_ptr.vmem [resolvable:$true] %s1945_s16 }
 0x3e6   : > { %2627 = dma.vmem_to_hbm [thread:$0]  (%p2662_p1), %s1946_s16, 2048, %s1948_s9, [#allocation7], %s2943_s17, %s2943_s17, %s2944_s25  }
 0x3e7 PF: > { %p2663_p2 = scmp.ge.s32.totalorder %s2932_s20, 2  ;;  %p2664_p3 = scmp.eq.s32.totalorder %s2110_s22, 4 }
 0x3e9   : > { %p2648_p4 = pnand %p2664_p3, %p2663_p2 }
 0x3eb   : > { %p2649_p5 = pneg %p2648_p4 }
 0x3ed   : > { %2919 = dma.done.wait (%p2649_p5), [#allocation7], 2048  }
 0x3ee   : > { %2921 = vsyncadd (%p2649_p5), [#allocation7], 4294965248  ;;  %s25_s20 = sadd.s32 1, %s2932_s20   ;;  %s3256_s18 = smov %s2928_s19 }
 0x3ef   : > { %p22_p6 = scmp.ge.s32.totalorder %s25_s20, 7   ;;  %s3257_s19 = smov %s3259_s23 }
 0x3f1   :  { %24 = sbr.rel (!%p22_p6) target bundleno = 8 (0x8), region = 178 }
 0x3f6   :  { %1969 = vsyncpa [#allocation6], 1 }
 0x3f7   :  { %1971 = vsyncpa [#allocation6 + $0x1], 1 }
 0x3f8   :  { %1972 = vsyncpa [#allocation9], 1 }
 0x3f9   :  { %1974 = vsyncpa [#allocation9 + $0x1], 1 }
 0x3fa   :  { %1975 = vsyncpa [#allocation12], 1 }
 0x3fb   :  { %1976 = vsyncpa [#allocation7], 1 }
 0x3fc   :  { %1978 = vsyncpa [#allocation7 + $0x1], 1 }

</bundles_post_ra>
